<compile_context>
chip_gen: v5e
topology: v5e:2x2
jax: 0.10.0
libtpu: 0.0.40
codegen_flags: <defaults>
</compile_context>

<pallas_src>
import functools

import jax
import jax.numpy as jnp
from jax.experimental import pallas as pl
from jax.experimental.pallas import tpu as pltpu

E_CHAR = 50
KERNEL_WIDTH = 5


def _round_up(x, m):
    return (x + m - 1) // m * m


def _model_embeddings_kernel(ids_ref, wcat_ref, bconv_ref, whw_ref, bhw_ref,
                             out_ref, *, l_out):
    tn, lw_pad = ids_ref.shape
    v_pad = wcat_ref.shape[0]
    e_word = bconv_ref.shape[1]
    k = wcat_ref.shape[1] // e_word
    m = tn * lw_pad

    # One-hot of the char ids, built ONCE per tile (this is the VPU-heavy step;
    # previously it was rebuilt per tap). The iota stays (1,1,v_pad) and is only
    # broadcast inside the compare.
    iota_v = jax.lax.broadcasted_iota(jnp.int32, (1, 1, v_pad), 2)
    onehot = (ids_ref[...][:, :, None] == iota_v).astype(jnp.float32)   # (tn,lw_pad,v_pad)
    onehot2 = onehot.reshape(m, v_pad)                                  # layout-preserving

    # Single matmul against the tap-concatenated, embedding-folded conv weights:
    # column block kk holds tap kk's contribution of the character at each
    # (word, position) row.
    g = jnp.dot(onehot2, wcat_ref[...],
                preferred_element_type=jnp.float32)                     # (m, k*e_word)

    # Conv tap accumulation: conv[(n,t), o] = sum_kk g[(n, t+kk), kk*e_word + o].
    # The per-tap time shift is a circular sublane roll (XLU slot); rows that wrap
    # past a word boundary land at time t >= l_out and are masked before the max.
    acc = g[:, :e_word]
    for kk in range(1, k):
        tap = g[:, kk * e_word:(kk + 1) * e_word]
        acc = acc + pltpu.roll(tap, shift=m - kk, axis=0)

    # Mask invalid conv positions (t >= l_out, incl. word-length padding), then max
    # over time.  relu(max(.) + b) == max(relu(. + b)) because ReLU is monotone.
    acc3 = acc.reshape(tn, lw_pad, e_word)                              # layout-preserving
    pos = jax.lax.broadcasted_iota(jnp.int32, (1, lw_pad, 1), 1)
    acc3 = acc3 + jnp.where(pos < l_out, 0.0, -jnp.inf)
    x_conv = jnp.maximum(jnp.max(acc3, axis=1) + bconv_ref[...], 0.0)   # (tn, e_word)

    # Highway: proj and gate fused into a single (e_word, 2*e_word) matmul.
    hw = jnp.dot(x_conv, whw_ref[...],
                 preferred_element_type=jnp.float32) + bhw_ref[...]     # (tn, 2*e_word)
    x_proj = jnp.maximum(hw[:, :e_word], 0.0)
    x_gate = jax.nn.sigmoid(hw[:, e_word:])
    x_hwy = x_gate * x_proj + (1.0 - x_gate) * x_conv

    # TODO(synk): Dropout(p=0.3) is identity in eval mode; training-mode masking omitted.

    out_w = out_ref.shape[1]
    if out_w == e_word:
        out_ref[...] = x_hwy
    else:  # lane-dense store: pad columns to a multiple of 128, sliced off in wrapper
        out_ref[...] = jnp.concatenate(
            [x_hwy, jnp.zeros((tn, out_w - e_word), jnp.float32)], axis=1)


def model_embeddings_forward(ids, emb_table, conv_w, conv_b, wp, bp, wg, bg,
                             *, block_n=512):
    """ids: (sentence_length, batch_size, max_word_length) int32 char indices.

    conv_w : (e_word, e_char, K) — torch Conv1d weight layout.
    wp/wg  : (e_word, e_word) highway weights acting as `x @ W + b`
             (i.e. torch Linear weights already transposed).
    """
    sl, bsz, lw = ids.shape
    n = sl * bsz
    e_word, e_char, k = conv_w.shape
    assert k == KERNEL_WIDTH and e_char == E_CHAR
    assert lw >= k, "max_word_length must be >= conv kernel width (l_out >= 1)"
    v = emb_table.shape[0]
    l_out = lw - k + 1

    # ---- parameter prep (plain XLA, once per call, tiny) ----
    # Fold the char embedding into the conv weights and concatenate the K taps along
    # the output columns (tap-major so taps 0..3 fill the first 128 lanes):
    #   w_cat[v, kk*e_word + o] = sum_c emb[v, c] * conv_w[o, c, kk]
    w_fold = jnp.einsum('vc,ock->kvo', emb_table.astype(jnp.float32),
                        conv_w.astype(jnp.float32))                    # (K, V, e_word)
    w_cat = jnp.transpose(w_fold, (1, 0, 2)).reshape(v, k * e_word)    # (V, K*e_word)
    v_pad = _round_up(v, 128)
    w_cat = jnp.pad(w_cat, ((0, v_pad - v), (0, 0)))
    w_hw = jnp.concatenate([wp, wg], axis=1)                           # (e_word, 2*e_word)
    b_hw = jnp.concatenate([bp, bg])[None, :]                          # (1, 2*e_word)
    b_conv = conv_b.reshape(1, e_word)

    # ---- word-tile sizing ----
    lw_pad = _round_up(lw, 8)
    n8 = _round_up(n, 8)

    # (a) Keep the in-kernel temporaries (one-hot LHS, tap matmul output, tap
    #     accumulator + one rolled slice) inside a ~20 MiB budget so the kernel fits
    #     the 32 MiB scoped-VMEM limit on every generation (v7x has 64 MiB physical).
    lane = 128
    bytes_per_word = 4 * lw_pad * (v_pad
                                   + _round_up(k * e_word, lane)
                                   + 2 * _round_up(e_word, lane))
    block_cap = max(8, (20 * 1024 * 1024 // bytes_per_word) // 8 * 8)
    # (b) Guarantee >= 2 grid steps when possible so the "parallel" word axis shards
    #     across both TensorCores on v7x.
    if n8 >= 16:
        block_n = min(block_n, _round_up(-(-n8 // 2), 8))
    block_n = min(block_n, block_cap)
    block_n = _round_up(min(block_n, n8), 8)
    n_pad = _round_up(n, block_n)

    # ---- ids prep: flatten words, pad word length & word count (shipped ONCE) ----
    ids_flat = jnp.pad(ids.reshape(n, lw).astype(jnp.int32),
                       ((0, n_pad - n), (0, lw_pad - lw)))

    out_w = _round_up(e_word, 128)
    grid = (n_pad // block_n,)

    out_padded = pl.pallas_call(
        functools.partial(_model_embeddings_kernel, l_out=l_out),
        out_shape=jax.ShapeDtypeStruct((n_pad, out_w), jnp.float32),
        grid=grid,
        in_specs=[
            pl.BlockSpec((block_n, lw_pad), lambda i: (i, 0)),         # ids (tiled)
            pl.BlockSpec((v_pad, k * e_word), lambda i: (0, 0)),       # folded conv weights
            pl.BlockSpec((1, e_word), lambda i: (0, 0)),               # conv bias
            pl.BlockSpec((e_word, 2 * e_word), lambda i: (0, 0)),      # highway weights
            pl.BlockSpec((1, 2 * e_word), lambda i: (0, 0)),           # highway bias
        ],
        out_specs=pl.BlockSpec((block_n, out_w), lambda i: (i, 0)),
        compiler_params=pltpu.CompilerParams(
            dimension_semantics=("parallel",),
            vmem_limit_bytes=32 * 1024 * 1024),
    )(ids_flat, w_cat, b_conv, w_hw, b_hw)

    return out_padded[:n, :e_word].reshape(sl, bsz, e_word)


def _reference_forward(ids, emb_table, conv_w, conv_b, wp, bp, wg, bg):
    """Pure-JAX reference matching the PyTorch module (eval mode)."""
    sl, bsz, lw = ids.shape
    e_word, e_char, k = conv_w.shape
    x = emb_table[ids.reshape(-1, lw)]                                 # (N, Lw, e_char)
    l_out = lw - k + 1
    windows = jnp.stack([x[:, t:t + k, :] for t in range(l_out)], axis=1)
    conv = jnp.einsum('ntkc,ock->nto', windows, conv_w) + conv_b
    x_conv = jnp.max(jax.nn.relu(conv), axis=1)
    x_proj = jax.nn.relu(x_conv @ wp + bp)
    x_gate = jax.nn.sigmoid(x_conv @ wg + bg)
    x_hwy = x_gate * x_proj + (1.0 - x_gate) * x_conv
    return x_hwy.reshape(sl, bsz, e_word)


if __name__ == "__main__":
    embed_size = 32          # e_word
    char_vocab = 96          # len(vocab.char2id)
    sentence_length = 4
    batch_size = 2
    max_word_length = 21

    root = jax.random.PRNGKey(0)
    k_ids, k_emb, k_cw, k_cb, k_wp, k_bp, k_wg, k_bg = jax.random.split(root, 8)

    ids = jax.random.randint(
        k_ids, (sentence_length, batch_size, max_word_length), 0, char_vocab,
        dtype=jnp.int32)
    emb_table = jax.random.normal(k_emb, (char_vocab, E_CHAR), jnp.float32) * 0.1
    conv_w = jax.random.normal(
        k_cw, (embed_size, E_CHAR, KERNEL_WIDTH), jnp.float32) * 0.05
    conv_b = jax.random.normal(k_cb, (embed_size,), jnp.float32) * 0.05
    wp = jax.random.normal(k_wp, (embed_size, embed_size), jnp.float32) * 0.05
    bp = jax.random.normal(k_bp, (embed_size,), jnp.float32) * 0.05
    wg = jax.random.normal(k_wg, (embed_size, embed_size), jnp.float32) * 0.05
    bg = jax.random.normal(k_bg, (embed_size,), jnp.float32) * 0.05

    out = model_embeddings_forward(ids, emb_table, conv_w, conv_b, wp, bp, wg, bg)
    out = jax.block_until_ready(out)
    assert out.shape == (sentence_length, batch_size, embed_size)
    assert out.dtype == jnp.float32

    ref = jax.block_until_ready(
        _reference_forward(ids, emb_table, conv_w, conv_b, wp, bp, wg, bg))
    assert jnp.allclose(out, ref, atol=1e-3, rtol=1e-3), float(
        jnp.max(jnp.abs(out - ref)))

    print("KERNEL_OK")
</pallas_src>

<mosaic_0001>
module attributes {stable_mosaic.version = 11 : i64} {
  func.func @_model_embeddings_kernel(%arg0: i32, %arg1: memref<8x24xi32, #tpu.memory_space<vmem>>, %arg2: memref<128x160xf32, #tpu.memory_space<vmem>>, %arg3: memref<1x32xf32, #tpu.memory_space<vmem>>, %arg4: memref<32x64xf32, #tpu.memory_space<vmem>>, %arg5: memref<1x64xf32, #tpu.memory_space<vmem>>, %arg6: memref<8x128xf32, #tpu.memory_space<vmem>>) attributes {dimension_semantics = [#tpu.dimension_semantics<parallel>], iteration_bounds = array<i64: 1>, scalar_prefetch = 0 : i64, scratch_operands = 0 : i64, tpu.core_type = #tpu.core_type<tc>, window_params = [{transform_indices = @transform_0, window_bounds = array<i64: 8, 24>}, {pipeline_mode = #tpu.pipeline_mode<synchronous>, transform_indices = @transform_1, window_bounds = array<i64: 128, 160>}, {pipeline_mode = #tpu.pipeline_mode<synchronous>, transform_indices = @transform_2, window_bounds = array<i64: 1, 32>}, {pipeline_mode = #tpu.pipeline_mode<synchronous>, transform_indices = @transform_3, window_bounds = array<i64: 32, 64>}, {pipeline_mode = #tpu.pipeline_mode<synchronous>, transform_indices = @transform_4, window_bounds = array<i64: 1, 64>}, {transform_indices = @transform_5, window_bounds = array<i64: 8, 128>}]} {
    %0 = tpu.iota {dimensions = array<i32: 2>} : vector<1x1x128xi32>
    %c0 = arith.constant 0 : index
    %c0_0 = arith.constant 0 : index
    %1 = vector.load %arg1[%c0, %c0_0] : memref<8x24xi32, #tpu.memory_space<vmem>>, vector<8x24xi32>
    %2 = vector.shape_cast %1 : vector<8x24xi32> to vector<8x24x1xi32>
    %3 = vector.broadcast %2 : vector<8x24x1xi32> to vector<8x24x128xi32>
    %4 = vector.broadcast %0 : vector<1x1x128xi32> to vector<8x24x128xi32>
    %5 = arith.cmpi eq, %3, %4 : vector<8x24x128xi32>
    %6 = arith.extui %5 : vector<8x24x128xi1> to vector<8x24x128xi32>
    %7 = arith.sitofp %6 : vector<8x24x128xi32> to vector<8x24x128xf32>
    %8 = vector.shape_cast %7 : vector<8x24x128xf32> to vector<192x128xf32>
    %c0_1 = arith.constant 0 : index
    %c0_2 = arith.constant 0 : index
    %9 = vector.load %arg2[%c0_1, %c0_2] : memref<128x160xf32, #tpu.memory_space<vmem>>, vector<128x160xf32>
    %cst = arith.constant dense<0.000000e+00> : vector<192x160xf32>
    %10 = tpu.matmul %8, %9, %cst {dimension_numbers = #tpu.dot_dimension_numbers<[1], [0], [0], [1], [0, 0, 1, 1], [], []>} : vector<192x128xf32>, vector<128x160xf32>, vector<192x160xf32> -> vector<192x160xf32>
    %11 = vector.extract_strided_slice %10 {offsets = [0, 0], sizes = [192, 32], strides = [1, 1]} : vector<192x160xf32> to vector<192x32xf32>
    %12 = vector.extract_strided_slice %10 {offsets = [0, 32], sizes = [192, 32], strides = [1, 1]} : vector<192x160xf32> to vector<192x32xf32>
    %c191_i32 = arith.constant 191 : i32
    %13 = tpu.dynamic_rotate %12 by %c191_i32 dim 0 : vector<192x32xf32>, i32 -> vector<192x32xf32>
    %14 = arith.addf %11, %13 : vector<192x32xf32>
    %15 = vector.extract_strided_slice %10 {offsets = [0, 64], sizes = [192, 32], strides = [1, 1]} : vector<192x160xf32> to vector<192x32xf32>
    %c190_i32 = arith.constant 190 : i32
    %16 = tpu.dynamic_rotate %15 by %c190_i32 dim 0 : vector<192x32xf32>, i32 -> vector<192x32xf32>
    %17 = arith.addf %14, %16 : vector<192x32xf32>
    %18 = vector.extract_strided_slice %10 {offsets = [0, 96], sizes = [192, 32], strides = [1, 1]} : vector<192x160xf32> to vector<192x32xf32>
    %c189_i32 = arith.constant 189 : i32
    %19 = tpu.dynamic_rotate %18 by %c189_i32 dim 0 : vector<192x32xf32>, i32 -> vector<192x32xf32>
    %20 = arith.addf %17, %19 : vector<192x32xf32>
    %21 = vector.extract_strided_slice %10 {offsets = [0, 128], sizes = [192, 32], strides = [1, 1]} : vector<192x160xf32> to vector<192x32xf32>
    %c188_i32 = arith.constant 188 : i32
    %22 = tpu.dynamic_rotate %21 by %c188_i32 dim 0 : vector<192x32xf32>, i32 -> vector<192x32xf32>
    %23 = arith.addf %20, %22 : vector<192x32xf32>
    %24 = vector.shape_cast %23 : vector<192x32xf32> to vector<8x24x32xf32>
    %25 = tpu.iota {dimensions = array<i32: 1>} : vector<1x24x1xi32>
    %c17_i32 = arith.constant 17 : i32
    %26 = vector.broadcast %c17_i32 : i32 to vector<1x24x1xi32>
    %27 = arith.cmpi slt, %25, %26 : vector<1x24x1xi32>
    %cst_3 = arith.constant 0.000000e+00 : f32
    %cst_4 = arith.constant 0xFF800000 : f32
    %28 = vector.broadcast %cst_3 : f32 to vector<1x24x1xf32>
    %29 = vector.broadcast %cst_4 : f32 to vector<1x24x1xf32>
    %30 = arith.select %27, %28, %29 : vector<1x24x1xi1>, vector<1x24x1xf32>
    %31 = vector.broadcast %30 : vector<1x24x1xf32> to vector<8x24x32xf32>
    %32 = arith.addf %24, %31 : vector<8x24x32xf32>
    %cst_5 = arith.constant dense<0xFF800000> : vector<8x32xf32>
    %33 = vector.multi_reduction <maximumf>, %32, %cst_5 [1] : vector<8x24x32xf32> to vector<8x32xf32>
    %c0_6 = arith.constant 0 : index
    %c0_7 = arith.constant 0 : index
    %34 = vector.load %arg3[%c0_6, %c0_7] : memref<1x32xf32, #tpu.memory_space<vmem>>, vector<1x32xf32>
    %35 = vector.broadcast %34 : vector<1x32xf32> to vector<8x32xf32>
    %36 = arith.addf %33, %35 : vector<8x32xf32>
    %cst_8 = arith.constant 0.000000e+00 : f32
    %37 = vector.broadcast %cst_8 : f32 to vector<8x32xf32>
    %38 = arith.maximumf %36, %37 : vector<8x32xf32>
    %c0_9 = arith.constant 0 : index
    %c0_10 = arith.constant 0 : index
    %39 = vector.load %arg4[%c0_9, %c0_10] : memref<32x64xf32, #tpu.memory_space<vmem>>, vector<32x64xf32>
    %cst_11 = arith.constant dense<0.000000e+00> : vector<8x64xf32>
    %40 = tpu.matmul %38, %39, %cst_11 {dimension_numbers = #tpu.dot_dimension_numbers<[1], [0], [0], [1], [0, 0, 1, 1], [], []>} : vector<8x32xf32>, vector<32x64xf32>, vector<8x64xf32> -> vector<8x64xf32>
    %c0_12 = arith.constant 0 : index
    %c0_13 = arith.constant 0 : index
    %41 = vector.load %arg5[%c0_12, %c0_13] : memref<1x64xf32, #tpu.memory_space<vmem>>, vector<1x64xf32>
    %42 = vector.broadcast %41 : vector<1x64xf32> to vector<8x64xf32>
    %43 = arith.addf %40, %42 : vector<8x64xf32>
    %44 = vector.extract_strided_slice %43 {offsets = [0, 0], sizes = [8, 32], strides = [1, 1]} : vector<8x64xf32> to vector<8x32xf32>
    %cst_14 = arith.constant 0.000000e+00 : f32
    %45 = vector.broadcast %cst_14 : f32 to vector<8x32xf32>
    %46 = arith.maximumf %44, %45 : vector<8x32xf32>
    %47 = vector.extract_strided_slice %43 {offsets = [0, 32], sizes = [8, 32], strides = [1, 1]} : vector<8x64xf32> to vector<8x32xf32>
    %48 = arith.negf %47 : vector<8x32xf32>
    %49 = math.exp %48 : vector<8x32xf32>
    %cst_15 = arith.constant 1.000000e+00 : f32
    %50 = vector.broadcast %cst_15 : f32 to vector<8x32xf32>
    %51 = arith.addf %50, %49 : vector<8x32xf32>
    %52 = arith.divf %50, %51 : vector<8x32xf32>
    %53 = arith.mulf %52, %46 : vector<8x32xf32>
    %cst_16 = arith.constant 1.000000e+00 : f32
    %54 = vector.broadcast %cst_16 : f32 to vector<8x32xf32>
    %55 = arith.subf %54, %52 : vector<8x32xf32>
    %56 = arith.mulf %55, %38 : vector<8x32xf32>
    %57 = arith.addf %53, %56 : vector<8x32xf32>
    %cst_17 = arith.constant 0.000000e+00 : f32
    %58 = vector.broadcast %cst_17 : f32 to vector<8x96xf32>
    %59 = tpu.concatenate %57, %58 in 1 : vector<8x32xf32>, vector<8x96xf32> -> vector<8x128xf32>
    %c0_18 = arith.constant 0 : index
    %c0_19 = arith.constant 0 : index
    %60 = vector.load %arg6[%c0_18, %c0_19] : memref<8x128xf32, #tpu.memory_space<vmem>>, vector<8x128xf32>
    tpu.vector_store %arg6[%c0_18, %c0_19], %59 {strides = array<i32>} : memref<8x128xf32, #tpu.memory_space<vmem>>, vector<8x128xf32>,
    return
  }
  func.func @transform_0(%arg0: i32) -> (i32, i32) {
    %c0_i32 = arith.constant 0 : i32
    %c0_i32_0 = arith.constant 0 : i32
    return %arg0, %c0_i32 : i32, i32
  }
  func.func @transform_1(%arg0: i32) -> (i32, i32) {
    %c0_i32 = arith.constant 0 : i32
    %c0_i32_0 = arith.constant 0 : i32
    %c0_i32_1 = arith.constant 0 : i32
    return %c0_i32, %c0_i32_0 : i32, i32
  }
  func.func @transform_2(%arg0: i32) -> (i32, i32) {
    %c0_i32 = arith.constant 0 : i32
    %c0_i32_0 = arith.constant 0 : i32
    %c0_i32_1 = arith.constant 0 : i32
    return %c0_i32, %c0_i32_0 : i32, i32
  }
  func.func @transform_3(%arg0: i32) -> (i32, i32) {
    %c0_i32 = arith.constant 0 : i32
    %c0_i32_0 = arith.constant 0 : i32
    %c0_i32_1 = arith.constant 0 : i32
    return %c0_i32, %c0_i32_0 : i32, i32
  }
  func.func @transform_4(%arg0: i32) -> (i32, i32) {
    %c0_i32 = arith.constant 0 : i32
    %c0_i32_0 = arith.constant 0 : i32
    %c0_i32_1 = arith.constant 0 : i32
    return %c0_i32, %c0_i32_0 : i32, i32
  }
  func.func @transform_5(%arg0: i32) -> (i32, i32) {
    %c0_i32 = arith.constant 0 : i32
    %c0_i32_0 = arith.constant 0 : i32
    return %arg0, %c0_i32 : i32, i32
  }
}

</mosaic_0001>

<bundles_post_ra>
// kernel: tpu_custom_call.1
= control target key start
LH: loop header
LB: loop body
LE: loop exit
PB: predicated region body
PF: predicated region fallthrough
CT: control target
= control target key end

     0   :  { %v21_v0 = vlaneseq  ;;  %s2540_s0 = inlined_call_operand.vmem [shape: s32[8,24], index: 0, kind: input, shape index: {}]   ;;  %s2541_s1 = inlined_call_operand.vmem [shape: f32[128,160], index: 1, kind: input, shape index: {}]   ;;  %s2542_s2 = inlined_call_operand.vmem [shape: f32[1,32], index: 2, kind: input, shape index: {}]   ;;  %s2543_s3 = inlined_call_operand.vmem [shape: f32[32,64], index: 3, kind: input, shape index: {}]   ;;  %s2544_s4 = inlined_call_operand.vmem [shape: f32[1,64], index: 4, kind: input, shape index: {}]   ;;  %s2545_s5 = inlined_call_operand.hbm [shape: f32[8,128], index: 5, kind: output, shape index: {}]  }
   0x1   :  { %10 = vsyncpa [#allocation3], 0  ;;  %v1453_v3 = vld [vmem:[%s2540_s0] sm:$0xff]  ;;  %v278_v10 = vld [vmem:[%s2541_s1 + $0xf0] sm:$0xff]  ;;  %v1407_v47 = vmov 1.0   ;;  %s1409_s6 = smov 64  }
   0x2   :  { %v1444_v1 = vshrl.u32 %v21_v0, 7  ;;  %v100_v5 = vperm.slane %v1453_v3, 4  ;;  %v24_v6 = vperm.slane %v1453_v3, 0  ;;  %v119_v7 = vperm.slane %v1453_v3, 5  ;;  %v276_v11 = vld [vmem:[%s2541_s1 + $0xe0] sm:$0xff]  ;;  %v279_v12 = vld [vmem:[%s2541_s1 + $0xf8] sm:$0xff]  ;;  %1319 = vmatpush.msra.mxu3 %v278_v10  ;;  %280 = vmatpush.msra.mxu0 %v278_v10 }
   0x3   :  { %v43_v8 = vperm.slane %v1453_v3, 1  ;;  %v1470_v9 = vperm.slane %v1453_v3, 6  ;;  %1335 = vmatpush.msra.mxu2 %v279_v12  ;;  %v277_v13 = vld [vmem:[%s2541_s1 + $0xe8] sm:$0xff]  ;;  %v274_v14 = vld [vmem:[%s2541_s1 + $0xd0] sm:$0xff]  ;;  %369 = vmatpush.msra.mxu1 %v279_v12  ;;  %v62_v15 = vperm.slane %v1453_v3, 2  ;;  %v272_v16 = vld [vmem:[%s2541_s1 + $0xc0] sm:$0xff] }
   0x4   :  { %1357 = vset.pattern.permute.xlu0 %v1444_v1  ;;  %v1448_v2 = vadd.s32 8, %v1444_v1  ;;  %v1456_v4 = vadd.s32 16, %v1444_v1  ;;  %1320 = vmatpush.msra.mxu3 %v276_v11  ;;  %v275_v17 = vld [vmem:[%s2541_s1 + $0xd8] sm:$0xff]  ;;  %v270_v18 = vld [vmem:[%s2541_s1 + $0xb0] sm:$0xff]  ;;  %v273_v19 = vld [vmem:[%s2541_s1 + $0xc8] sm:$0xff]  ;;  %v157_v38 = vperm.slane %v1453_v3, 7 }
   0x5   :  { %1336 = vmatpush.msra.mxu2 %v277_v13  ;;  %281 = vmatpush.msra.mxu0 %v276_v11  ;;  %v268_v20 = vld [vmem:[%s2541_s1 + $0xa0] sm:$0xff]  ;;  %v271_v21 = vld [vmem:[%s2541_s1 + $0xb8] sm:$0xff]  ;;  %v266_v22 = vld [vmem:[%s2541_s1 + $0x90] sm:$0xff]  ;;  %v81_v44 = vperm.slane %v1453_v3, 3  ;;  %v1584_v45 = vand.u32 127, %v21_v0  ;;  %s1410_s7 = smov 32  }
   0x6   :  { %1358 = vset.pattern.permute.xlu1 %v1448_v2  ;;  %1359 = vset.pattern.permute.xlu2 %v1456_v4  ;;  %v269_v23 = vld [vmem:[%s2541_s1 + $0xa8] sm:$0xff]  ;;  %v264_v24 = vld [vmem:[%s2541_s1 + $0x80] sm:$0xff]  ;;  %v267_v25 = vld [vmem:[%s2541_s1 + $0x98] sm:$0xff]  ;;  %s1236_s20 = sshll.u32 %s2545_s5, 4  ;;  %s1237_s20 = int_to_ptr.hbm [resolvable:$true] %s1236_s20 }
   0x7   :  { %370 = vmatpush.msra.mxu1 %v277_v13  ;;  %1321 = vmatpush.msra.mxu3 %v274_v14  ;;  %v262_v26 = vld [vmem:[%s2541_s1 + $0x70] sm:$0xff]  ;;  %v265_v27 = vld [vmem:[%s2541_s1 + $0x88] sm:$0xff]  ;;  %v260_v28 = vld [vmem:[%s2541_s1 + $0x60] sm:$0xff] }
   0x8   :  { %282 = vmatpush.msra.mxu0 %v274_v14  ;;  %1337 = vmatpush.msra.mxu2 %v275_v17  ;;  %v263_v29 = vld [vmem:[%s2541_s1 + $0x78] sm:$0xff]  ;;  %v258_v30 = vld [vmem:[%s2541_s1 + $0x50] sm:$0xff]  ;;  %v261_v31 = vld [vmem:[%s2541_s1 + $0x68] sm:$0xff] }
   0x9   :  { %1322 = vmatpush.msra.mxu3 %v272_v16  ;;  %371 = vmatpush.msra.mxu1 %v275_v17  ;;  %v256_v32 = vld [vmem:[%s2541_s1 + $0x40] sm:$0xff]  ;;  %v259_v33 = vld [vmem:[%s2541_s1 + $0x58] sm:$0xff]  ;;  %v254_v34 = vld [vmem:[%s2541_s1 + $0x30] sm:$0xff] }
   0xa   :  { %283 = vmatpush.msra.mxu0 %v272_v16  ;;  %1338 = vmatpush.msra.mxu2 %v273_v19  ;;  %v257_v35 = vld [vmem:[%s2541_s1 + $0x48] sm:$0xff]  ;;  %v252_v36 = vld [vmem:[%s2541_s1 + $0x20] sm:$0xff]  ;;  %v255_v37 = vld [vmem:[%s2541_s1 + $0x38] sm:$0xff] }
   0xb   :  { %1323 = vmatpush.msra.mxu3 %v270_v18  ;;  %372 = vmatpush.msra.mxu1 %v273_v19  ;;  %v250_v39 = vld [vmem:[%s2541_s1 + $0x10] sm:$0xff]  ;;  %v253_v40 = vld [vmem:[%s2541_s1 + $0x28] sm:$0xff]  ;;  %v248_v41 = vld [vmem:[%s2541_s1] sm:$0xff] }
   0xc   :  { %105 = vperm.xlu0 %1357, %v100_v5   ;;  %284 = vmatpush.msra.mxu0 %v270_v18  ;;  %v251_v42 = vld [vmem:[%s2541_s1 + $0x18] sm:$0xff]  ;;  %v249_v43 = vld [vmem:[%s2541_s1 + $0x8] sm:$0xff]  ;;  %s1408_s1 = smov 96  }
   0xd   :  { %1324 = vmatpush.msra.mxu3 %v268_v20  ;;  %1339 = vmatpush.msra.mxu2 %v271_v21 }
   0xe   :  { %111 = vperm.xlu1 %1358, %v100_v5   ;;  %117 = vperm.xlu2 %1359, %v100_v5  }
   0xf   :  { %373 = vmatpush.msra.mxu1 %v271_v21  ;;  %285 = vmatpush.msra.mxu0 %v268_v20 }
  0x10   :  { %1325 = vmatpush.msra.mxu3 %v266_v22  ;;  %1340 = vmatpush.msra.mxu2 %v269_v23 }
  0x11   :  { %374 = vmatpush.msra.mxu1 %v269_v23  ;;  %286 = vmatpush.msra.mxu0 %v266_v22 }
  0x12   :  { %1326 = vmatpush.msra.mxu3 %v264_v24  ;;  %1341 = vmatpush.msra.mxu2 %v267_v25 }
  0x13   :  { %375 = vmatpush.msra.mxu1 %v267_v25  ;;  %287 = vmatpush.msra.mxu0 %v264_v24 }
  0x14   :  { %29 = vperm.xlu0 %1357, %v24_v6   ;;  %1327 = vmatpush.msra.mxu3 %v262_v26 }
  0x15   :  { %1342 = vmatpush.msra.mxu2 %v265_v27  ;;  %376 = vmatpush.msra.mxu1 %v265_v27 }
  0x16   :  { %35 = vperm.xlu1 %1358, %v24_v6   ;;  %41 = vperm.xlu2 %1359, %v24_v6  }
  0x17   :  { %1328 = vmatpush.msra.mxu3 %v260_v28  ;;  %1343 = vmatpush.msra.mxu2 %v263_v29 }
  0x18   :  { %288 = vmatpush.msra.mxu0 %v262_v26  ;;  %377 = vmatpush.msra.mxu1 %v263_v29 }
  0x19   :  { %1329 = vmatpush.msra.mxu3 %v258_v30  ;;  %1344 = vmatpush.msra.mxu2 %v261_v31 }
  0x1a   :  { %289 = vmatpush.msra.mxu0 %v260_v28  ;;  %378 = vmatpush.msra.mxu1 %v261_v31 }
  0x1b   :  { %1330 = vmatpush.msra.mxu3 %v256_v32  ;;  %1345 = vmatpush.msra.mxu2 %v259_v33 }
  0x1c   :  { %124 = vperm.xlu0 %1357, %v119_v7   ;;  %290 = vmatpush.msra.mxu0 %v258_v30 }
  0x1d   :  { %1331 = vmatpush.msra.mxu3 %v254_v34  ;;  %1346 = vmatpush.msra.mxu2 %v257_v35 }
  0x1e   :  { %1360 = vset.pattern.permute.xlu1 %v1444_v1  ;;  %1361 = vset.pattern.permute.xlu2 %v1448_v2 }
  0x1f   :  { %1332 = vmatpush.msra.mxu3 %v252_v36  ;;  %1347 = vmatpush.msra.mxu2 %v255_v37 }
  0x20   :  { %379 = vmatpush.msra.mxu1 %v259_v33  ;;  %291 = vmatpush.msra.mxu0 %v256_v32 }
  0x21   :  { %1333 = vmatpush.msra.mxu3 %v250_v39  ;;  %1348 = vmatpush.msra.mxu2 %v253_v40 }
  0x22   :  { %380 = vmatpush.msra.mxu1 %v257_v35  ;;  %292 = vmatpush.msra.mxu0 %v254_v34 }
  0x23   :  { %1334 = vmatpush.msra.mxu3 %v248_v41  ;;  %1349 = vmatpush.msra.mxu2 %v251_v42 }
  0x24   :  { %1362 = vset.pattern.permute.xlu0 %v1448_v2  ;;  %381 = vmatpush.msra.mxu1 %v255_v37 }
  0x25   :  { %1350 = vmatpush.msra.mxu2 %v249_v43  ;;  %293 = vmatpush.msra.mxu0 %v252_v36 }
  0x26   :  { %48 = vperm.xlu1 %1360, %v43_v8   ;;  %130 = vperm.xlu2 %1361, %v119_v7  }
  0x27   :  { %382 = vmatpush.msra.mxu1 %v253_v40  ;;  %294 = vmatpush.msra.mxu0 %v250_v39 }
  0x29   :  { %383 = vmatpush.msra.mxu1 %v251_v42  ;;  %295 = vmatpush.msra.mxu0 %v248_v41 }
  0x2b   :  { %384 = vmatpush.msra.mxu1 %v249_v43 }
  0x2c   :  { %54 = vperm.xlu0 %1362, %v43_v8  }
  0x2e   :  { %1363 = vset.pattern.permute.xlu1 %v1456_v4  ;;  %1364 = vset.pattern.permute.xlu2 %v1456_v4 }
  0x34   :  { %149 = vperm.xlu0 %1362, %v1470_v9  }
  0x36   :  { %136 = vperm.xlu1 %1363, %v119_v7   ;;  %60 = vperm.xlu2 %1364, %v43_v8  }
  0x3c   :  { %1369 = vset.pattern.permute.xlu0 %v1456_v4 }
  0x3e   :  { %1365 = vset.pattern.permute.xlu1 %v1444_v1  ;;  %1366 = vset.pattern.permute.xlu2 %v1444_v1 }
  0x44   :  { %79 = vperm.xlu0 %1369, %v62_v15  }
  0x46   :  { %143 = vperm.xlu1 %1365, %v1470_v9   ;;  %67 = vperm.xlu2 %1366, %v62_v15  }
  0x4c   :  { %174 = vperm.xlu0 %1369, %v157_v38  }
  0x4e   :  { %1367 = vset.pattern.permute.xlu1 %v1448_v2  ;;  %1368 = vset.pattern.permute.xlu2 %v1456_v4 }
  0x56   :  { %73 = vperm.xlu1 %1367, %v62_v15   ;;  %155 = vperm.xlu2 %1368, %v1470_v9  }
  0x5e   :  { %1370 = vset.pattern.permute.xlu1 %v1444_v1  ;;  %1371 = vset.pattern.permute.xlu2 %v1444_v1 }
  0x66   :  { %162 = vperm.xlu1 %1370, %v157_v38   ;;  %86 = vperm.xlu2 %1371, %v81_v44  }
  0x68   :  { %v118_v49 = vpop.permute.xlu2 %117 }
  0x69   :  { %vm190_vm3 = vcmp.eq.s32.totalorder %v118_v49, %v1584_v45 }
  0x6e   :  { %1372 = vset.pattern.permute.xlu1 %v1448_v2  ;;  %1373 = vset.pattern.permute.xlu2 %v1448_v2 }
  0x70   :  { %v42_v52 = vpop.permute.xlu2 %41 }
  0x71   :  { %vm178_vm6 = vcmp.eq.s32.totalorder %v42_v52, %v1584_v45 }
  0x76   :  { %168 = vperm.xlu1 %1372, %v157_v38   ;;  %92 = vperm.xlu2 %1373, %v81_v44  }
  0x7e   :  { %v1586_v46 = vpop.permute.xlu0 %105  ;;  %1374 = vset.pattern.permute.xlu1 %v1456_v4 }
  0x7f   :  { %vm188_vm0 = vcmp.eq.s32.totalorder %v1586_v46, %v1584_v45 }
  0x80   :  { %1281 = vmatmul.msk.f32.vlgmr.msra.gmra.mxu3 %vm188_vm0, %v1407_v47  ;;  %v112_v48 = vpop.permute.xlu1 %111  ;;  %v131_v54 = vpop.permute.xlu2 %130 }
  0x81   :  { %vm189_vm1 = vcmp.eq.s32.totalorder %v112_v48, %v1584_v45  ;;  %vm192_vm7 = vcmp.eq.s32.totalorder %v131_v54, %v1584_v45 }
  0x82   :  { %1306 = vmatmul.msk.f32.vlgmr.msra.gmra.mxu2 %vm189_vm1, %v1407_v47 }
  0x86   :  { %v30_v50 = vpop.permute.xlu0 %29  ;;  %98 = vperm.xlu1 %1374, %v81_v44  }
  0x87   :  { %vm176_vm2 = vcmp.eq.s32.totalorder %v30_v50, %v1584_v45 }
  0x88   :  { %1269 = vmatmul.msk.f32.vlgmr.msra.gmra.mxu0 %vm176_vm2, %v1407_v47  ;;  %1282 = vmatmul.msk.f32.gmra.mxu3 %vm189_vm1, %v1407_v47  ;;  %v36_v51 = vpop.permute.xlu1 %35 }
  0x89   :  { %1293 = vmatmul.msk.f32.vlgmr.msra.gmra.mxu1 %vm176_vm2, %v1407_v47  ;;  %vm177_vm4 = vcmp.eq.s32.totalorder %v36_v51, %v1584_v45 }
  0x8a   :  { %1307 = vmatmul.msk.f32.gmra.mxu2 %vm190_vm3, %v1407_v47 }
  0x8e   :  { %v125_v53 = vpop.permute.xlu0 %124 }
  0x8f   :  { %vm191_vm5 = vcmp.eq.s32.totalorder %v125_v53, %v1584_v45 }
  0x90   :  { %1270 = vmatmul.msk.f32.gmra.mxu0 %vm177_vm4, %v1407_v47  ;;  %1283 = vmatmul.msk.f32.gmra.mxu3 %vm190_vm3, %v1407_v47  ;;  %v61_v58 = vpop.permute.xlu2 %60 }
  0x91   :  { %1294 = vmatmul.msk.f32.gmra.mxu1 %vm177_vm4, %v1407_v47  ;;  %vm181_vm11 = vcmp.eq.s32.totalorder %v61_v58, %v1584_v45 }
  0x92   :  { %1308 = vmatmul.msk.f32.gmra.mxu2 %vm191_vm5, %v1407_v47 }
  0x98   :  { %1271 = vmatmul.msk.f32.gmra.mxu0 %vm178_vm6, %v1407_v47  ;;  %1284 = vmatmul.msk.f32.gmra.mxu3 %vm191_vm5, %v1407_v47  ;;  %v49_v55 = vpop.permute.xlu1 %48 }
  0x99   :  { %1295 = vmatmul.msk.f32.gmra.mxu1 %vm178_vm6, %v1407_v47  ;;  %vm179_vm8 = vcmp.eq.s32.totalorder %v49_v55, %v1584_v45 }
  0x9a   :  { %1309 = vmatmul.msk.f32.gmra.mxu2 %vm192_vm7, %v1407_v47 }
  0x9e   :  { %v55_v56 = vpop.permute.xlu0 %54 }
  0x9f   :  { %vm180_vm9 = vcmp.eq.s32.totalorder %v55_v56, %v1584_v45 }
  0xa0   :  { %1285 = vmatmul.msk.f32.gmra.mxu3 %vm192_vm7, %v1407_v47  ;;  %1272 = vmatmul.msk.f32.gmra.mxu0 %vm179_vm8, %v1407_v47  ;;  %v68_v59 = vpop.permute.xlu2 %67 }
  0xa1   :  { %1296 = vmatmul.msk.f32.gmra.mxu1 %vm179_vm8, %v1407_v47  ;;  %vm182_vm12 = vcmp.eq.s32.totalorder %v68_v59, %v1584_v45 }
  0xa6   :  { %v150_v61 = vpop.permute.xlu0 %149 }
  0xa7   :  { %vm195_vm14 = vcmp.eq.s32.totalorder %v150_v61, %v1584_v45 }
  0xa8   :  { %1273 = vmatmul.msk.f32.gmra.mxu0 %vm180_vm9, %v1407_v47  ;;  %v137_v57 = vpop.permute.xlu1 %136 }
  0xa9   :  { %1297 = vmatmul.msk.f32.gmra.mxu1 %vm180_vm9, %v1407_v47  ;;  %vm193_vm10 = vcmp.eq.s32.totalorder %v137_v57, %v1584_v45  ;;  %vm725_vm9 = vcmp.lt.s32.totalorder %v1444_v1, 6 }
  0xaa   :  { %1286 = vmatmul.msk.f32.gmra.mxu3 %vm193_vm10, %v1407_v47  ;;  %1310 = vmatmul.msk.f32.gmra.mxu2 %vm193_vm10, %v1407_v47  ;;  %vm870_vm10 = vcmp.lt.s32.totalorder %v1444_v1, 5 }
  0xb0   :  { %1274 = vmatmul.msk.f32.gmra.mxu0 %vm181_vm11, %v1407_v47  ;;  %v156_v62 = vpop.permute.xlu2 %155 }
  0xb1   :  { %1298 = vmatmul.msk.f32.gmra.mxu1 %vm181_vm11, %v1407_v47  ;;  %vm196_vm15 = vcmp.eq.s32.totalorder %v156_v62, %v1584_v45  ;;  %vm580_vm11 = vcmp.lt.s32.totalorder %v1444_v1, 7 }
  0xb6   :  { %v80_v0 = vpop.permute.xlu0 %79 }
  0xb7   :  { %vm184_vm2 = vcmp.eq.s32.totalorder %v80_v0, %v1584_v45 }
  0xb8   :  { %1275 = vmatmul.msk.f32.gmra.mxu0 %vm182_vm12, %v1407_v47  ;;  %v144_v60 = vpop.permute.xlu1 %143 }
  0xb9   :  { %1299 = vmatmul.msk.f32.gmra.mxu1 %vm182_vm12, %v1407_v47  ;;  %vm194_vm13 = vcmp.eq.s32.totalorder %v144_v60, %v1584_v45  ;;  %vm1024_vm12 = vcmask 261120  }
  0xba   :  { %1287 = vmatmul.msk.f32.gmra.mxu3 %vm194_vm13, %v1407_v47  ;;  %1311 = vmatmul.msk.f32.gmra.mxu2 %vm194_vm13, %v1407_v47  ;;  %vm996_vm13 = vcmp.lt.s32.totalorder %v1456_v4, 17 }
  0xbe   :  { %v175_v7 = vpop.permute.xlu0 %174 }
  0xbf   :  { %vm199_vm7 = vcmp.eq.s32.totalorder %v175_v7, %v1584_v45 }
  0xc0   :  { %v87_v2 = vpop.permute.xlu2 %86 }
  0xc1   :  { %vm185_vm3 = vcmp.eq.s32.totalorder %v87_v2, %v1584_v45 }
  0xc2   :  { %1288 = vmatmul.msk.f32.gmra.mxu3 %vm195_vm14, %v1407_v47  ;;  %1312 = vmatmul.msk.f32.gmra.mxu2 %vm195_vm14, %v1407_v47  ;;  %vm1150_vm14 = vcmask 1041409  }
  0xc8   :  { %v74_v63 = vpop.permute.xlu1 %73 }
  0xc9   :  { %vm183_vm1 = vcmp.eq.s32.totalorder %v74_v63, %v1584_v45 }
  0xca   :  { %1313 = vmatmul.msk.f32.gmra.mxu2 %vm196_vm15, %v1407_v47  ;;  %1300 = vmatmul.msk.f32.gmra.mxu1 %vm183_vm1, %v1407_v47 }
  0xcb   :  { %1289 = vmatmul.msk.f32.gmra.mxu3 %vm196_vm15, %v1407_v47  ;;  %1276 = vmatmul.msk.f32.gmra.mxu0 %vm183_vm1, %v1407_v47  ;;  %vm1153_vm15 = vcmask 1042434   ;;  %vm1156_vm1 = vcmask 1043459  }
  0xd0   :  { %v93_v5 = vpop.permute.xlu2 %92 }
  0xd1   :  { %vm186_vm5 = vcmp.eq.s32.totalorder %v93_v5, %v1584_v45 }
  0xd2   :  { %1301 = vmatmul.msk.f32.gmra.mxu1 %vm184_vm2, %v1407_v47 }
  0xd3   :  { %1277 = vmatmul.msk.f32.gmra.mxu0 %vm184_vm2, %v1407_v47  ;;  %vm1159_vm2 = vcmask 1044484  }
  0xd8   :  { %v163_v3 = vpop.permute.xlu1 %162 }
  0xd9   :  { %vm197_vm4 = vcmp.eq.s32.totalorder %v163_v3, %v1584_v45 }
  0xda   :  { %1314 = vmatmul.msk.f32.gmra.mxu2 %vm197_vm4, %v1407_v47  ;;  %1302 = vmatmul.msk.f32.gmra.mxu1 %vm185_vm3, %v1407_v47 }
  0xdb   :  { %1290 = vmatmul.msk.f32.gmra.mxu3 %vm197_vm4, %v1407_v47  ;;  %1278 = vmatmul.msk.f32.gmra.mxu0 %vm185_vm3, %v1407_v47  ;;  %vm1162_vm3 = vcmask 1045509   ;;  %vm1165_vm4 = vcmask 1046534  }
  0xe2   :  { %1303 = vmatmul.msk.f32.gmra.mxu1 %vm186_vm5, %v1407_v47 }
  0xe3   :  { %1279 = vmatmul.msk.f32.gmra.mxu0 %vm186_vm5, %v1407_v47  ;;  %vm1168_vm5 = vcmask 1047559  }
  0xe8   :  { %v169_v6 = vpop.permute.xlu1 %168 }
  0xe9   :  { %vm198_vm6 = vcmp.eq.s32.totalorder %v169_v6, %v1584_v45 }
  0xea   :  { %1315 = vmatmul.msk.f32.gmra.mxu2 %vm198_vm6, %v1407_v47  ;;  %1291 = vmatmul.msk.f32.gmra.mxu3 %vm198_vm6, %v1407_v47 }
  0xf2   :  { %1316 = vmatmul.msk.f32.gmra.mxu2 %vm199_vm7, %v1407_v47  ;;  %1292 = vmatmul.msk.f32.gmra.mxu3 %vm199_vm7, %v1407_v47 }
  0xf8   :  { %v99_v8 = vpop.permute.xlu1 %98 }
  0xf9   :  { %vm187_vm8 = vcmp.eq.s32.totalorder %v99_v8, %v1584_v45 }
  0xfa   :  { %1304 = vmatmul.msk.f32.gmra.mxu1 %vm187_vm8, %v1407_v47  ;;  %1280 = vmatmul.msk.f32.gmra.mxu0 %vm187_vm8, %v1407_v47 }
 0x102   :  { %1305 = vmatmul.msk.f32.gmra.mxu1 %vm188_vm0, %v1407_v47  ;;  %vm943_vm0 = vcmp.lt.s32.totalorder %v1444_v1, 4 }
 0x103   :  { %v1668_v9 = vpop.f32.mrf.mxu3 }
 0x104   :  { %506 = vrot.lane.b32.xlu2 %v1668_v9, %s1408_s1 }
 0x105   :  { %v1672_v10 = vpop.f32.mrf.mxu0  ;;  %v1676_v12 = vpop.f32.mrf.mxu2 }
 0x106   :  { %v1674_v11 = vpop.f32.mrf.mxu1  ;;  %629 = vrot.lane.b32.xlu1 %v1672_v10, %s1409_s6  ;;  %482 = vrot.lane.b32.xlu0 %v1672_v10, %s1408_s1  ;;  %v2557_v13 = vrot.slane %v1676_v12, 4 }
 0x107   :  { %v2549_v17 = vrot.slane %v1674_v11, 4 }
 0x10b   :  { %v1720_v25 = vpop.f32.mrf.mxu3 }
 0x10d   :  { %v1683_v14 = vpop.f32.mrf.mxu0  ;;  %v1686_v16 = vpop.f32.mrf.mxu2 }
 0x10e   :  { %v389_v15 = vpop.f32.mrf.mxu1  ;;  %774 = vrot.lane.b32.xlu1 %v1672_v10, %s1410_s7  ;;  %653 = vrot.lane.b32.xlu0 %v1668_v9, %s1409_s6  ;;  %v2552_v19 = vrot.slane %v1686_v16, 4 }
 0x10f   :  { %v920_v18 = vrot.slane %v389_v15, 4  ;;  %631 = vrot.lane.b32.xlu2 %v1683_v14, %s1409_s6 }
 0x110   :  { %v1708_v21 = vsel %vm943_vm0, %v2557_v13, %v2552_v19 }
 0x111   :  { %v1700_v20 = vsel %vm943_vm0, %v2549_v17, %v920_v18 }
 0x113   :  { %v1745_v30 = vpop.f32.mrf.mxu3 }
 0x115   :  { %v1722_v26 = vpop.f32.mrf.mxu0 }
 0x116   :  { %v392_v22 = vpop.f32.mrf.mxu1  ;;  %798 = vrot.lane.b32.xlu0 %v1668_v9, %s1410_s7  ;;  %484 = vrot.lane.b32.xlu1 %v1683_v14, %s1408_s1 }
 0x117   :  { %v921_v23 = vrot.slane %v392_v22, 4  ;;  %776 = vrot.lane.b32.xlu2 %v1683_v14, %s1410_s7 }
 0x119   :  { %v1718_v24 = vsel %vm943_vm0, %v920_v18, %v921_v23 }
 0x11b   :  { %v1755_v32 = vpop.f32.mrf.mxu3 }
 0x11d   :  { %v1747_v31 = vpop.f32.mrf.mxu0 }
 0x11e   :  { %v1724_v27 = vpop.f32.mrf.mxu1  ;;  %508 = vrot.lane.b32.xlu1 %v1720_v25, %s1408_s1  ;;  %633 = vrot.lane.b32.xlu0 %v1722_v26, %s1409_s6 }
 0x11f   :  { %v2551_v28 = vrot.slane %v1724_v27, 4  ;;  %655 = vrot.lane.b32.xlu2 %v1720_v25, %s1409_s6 }
 0x121   :  { %v1737_v29 = vsel %vm943_vm0, %v921_v23, %v2551_v28 }
 0x123   :  { %v1771_v34 = vpop.f32.mrf.mxu3 }
 0x125   :  { %v1763_v33 = vpop.f32.mrf.mxu0 }
 0x126   :  { %800 = vrot.lane.b32.xlu1 %v1720_v25, %s1410_s7  ;;  %778 = vrot.lane.b32.xlu0 %v1722_v26, %s1410_s7  ;;  %v1779_v35 = vpop.f32.mrf.mxu1 }
 0x127   :  { %486 = vrot.lane.b32.xlu2 %v1722_v26, %s1408_s1 }
 0x12d   :  { %v1781_v36 = vpop.f32.mrf.mxu0  ;;  %v1791_v38 = vpop.f32.mrf.mxu3 }
 0x12e   :  { %657 = vrot.lane.b32.xlu0 %v1745_v30, %s1409_s6  ;;  %780 = vrot.lane.b32.xlu1 %v1747_v31, %s1410_s7  ;;  %v1789_v37 = vpop.f32.mrf.mxu1 }
 0x12f   :  { %510 = vrot.lane.b32.xlu2 %v1745_v30, %s1408_s1 }
 0x135   :  { %v1809_v41 = vpop.f32.mrf.mxu0 }
 0x136   :  { %659 = vrot.lane.b32.xlu1 %v1755_v32, %s1409_s6  ;;  %635 = vrot.lane.b32.xlu0 %v1747_v31, %s1409_s6  ;;  %v1799_v39 = vpop.f32.mrf.mxu1 }
 0x137   :  { %802 = vrot.lane.b32.xlu2 %v1745_v30, %s1410_s7 }
 0x13d   :  { %v1821_v44 = vpop.f32.mrf.mxu3 }
 0x13e   :  { %512 = vrot.lane.b32.xlu0 %v1755_v32, %s1408_s1  ;;  %637 = vrot.lane.b32.xlu1 %v1763_v33, %s1409_s6 }
 0x13f   :  { %488 = vrot.lane.b32.xlu2 %v1747_v31, %s1408_s1 }
 0x145   :  { %v1835_v48 = vpop.f32.mrf.mxu3 }
 0x146   :  { %804 = vrot.lane.b32.xlu0 %v1755_v32, %s1410_s7  ;;  %514 = vrot.lane.b32.xlu1 %v1771_v34, %s1408_s1 }
 0x147   :  { %782 = vrot.lane.b32.xlu2 %v1763_v33, %s1410_s7  ;;  %v1811_v42 = vpop.f32.mrf.mxu1 }
 0x148   :  { %v1823_v45 = vpop.f32.mrf.mxu0 }
 0x14e   :  { %661 = vrot.lane.b32.xlu1 %v1771_v34, %s1409_s6  ;;  %490 = vrot.lane.b32.xlu0 %v1763_v33, %s1408_s1  ;;  %v1891_v5 = vpop.f32.mrf.mxu3 }
 0x14f   :  { %639 = vrot.lane.b32.xlu2 %v1781_v36, %s1409_s6  ;;  %v1825_v46 = vpop.f32.mrf.mxu1 }
 0x150   :  { %v1858_v56 = vpop.f32.mrf.mxu0 }
 0x156   :  { %806 = vrot.lane.b32.xlu0 %v1771_v34, %s1410_s7  ;;  %492 = vrot.lane.b32.xlu1 %v1781_v36, %s1408_s1 }
 0x157   :  { %516 = vrot.lane.b32.xlu2 %v1791_v38, %s1408_s1  ;;  %v1844_v49 = vpop.f32.mrf.mxu1 }
 0x15e   :  { %784 = vrot.lane.b32.xlu0 %v1781_v36, %s1410_s7  ;;  %808 = vrot.lane.b32.xlu1 %v1791_v38, %s1410_s7  ;;  %v1807_v40 = vpop.permute.xlu2 %506 }
 0x15f   :  { %663 = vrot.lane.b32.xlu2 %v1791_v38, %s1409_s6  ;;  %v1875_v62 = vpop.f32.mrf.mxu1 }
 0x166   :  { %786 = vrot.lane.b32.xlu1 %v1809_v41, %s1410_s7  ;;  %641 = vrot.lane.b32.xlu0 %v1809_v41, %s1409_s6 }
 0x167   :  { %494 = vrot.lane.b32.xlu2 %v1809_v41, %s1408_s1 }
 0x169   :  { %v1819_v43 = vpop.permute.xlu2 %631 }
 0x16a   :  { %v702_v51 = vrot.slane %v1819_v43, 2 }
 0x16e   :  { %518 = vrot.lane.b32.xlu0 %v1821_v44, %s1408_s1  ;;  %643 = vrot.lane.b32.xlu1 %v1823_v45, %s1409_s6 }
 0x16f   :  { %810 = vrot.lane.b32.xlu2 %v1821_v44, %s1410_s7 }
 0x171   :  { %v1833_v47 = vpop.permute.xlu2 %776 }
 0x172   :  { %v847_v58 = vrot.slane %v1833_v47, 3 }
 0x176   :  { %665 = vrot.lane.b32.xlu0 %v1821_v44, %s1409_s6  ;;  %667 = vrot.lane.b32.xlu1 %v1835_v48, %s1409_s6 }
 0x177   :  { %788 = vrot.lane.b32.xlu2 %v1823_v45, %s1410_s7 }
 0x178   :  { %v1846_v50 = vpop.permute.xlu1 %629  ;;  %v1850_v53 = vpop.permute.xlu0 %482 }
 0x179   :  { %2571 = vst [vmem:[#allocation5_spill] sm:$0xff] %v1846_v50  ;;  %v2547_v52 = vrot.slane %v1846_v50, 2  ;;  %v1852_v54 = vpop.permute.xlu2 %655  ;;  %v2550_v7 = vrot.slane %v1850_v53, 1 }
 0x17a   :  { %2572 = vst [vmem:[#allocation6_spill] sm:$0xff] %v1850_v53  ;;  %v2553_v63 = vrot.slane %v1852_v54, 2 }
 0x17b   :  { %v748_v55 = vsel %vm725_vm9, %v2547_v52, %v702_v51  ;;  %v1914_v52 = vpop.f32.mrf.mxu1 }
 0x17e   :  { %496 = vrot.lane.b32.xlu0 %v1823_v45, %s1408_s1  ;;  %498 = vrot.lane.b32.xlu1 %v1858_v56, %s1408_s1 }
 0x17f   :  { %520 = vrot.lane.b32.xlu2 %v1835_v48, %s1408_s1 }
 0x180   :  { %v1867_v57 = vpop.permute.xlu1 %774  ;;  %v1871_v60 = vpop.permute.xlu0 %653 }
 0x181   :  { %2573 = vst [vmem:[#allocation7_spill] sm:$0xff] %v1867_v57  ;;  %v2546_v59 = vrot.slane %v1867_v57, 3  ;;  %v1873_v61 = vpop.permute.xlu2 %486  ;;  %v2548_v0 = vrot.slane %v1871_v60, 2  ;;  %v2574_v57 = vrot.slane %v1676_v12, 4 }
 0x182   :  { %v556_v8 = vrot.slane %v1873_v61, 1 }
 0x183   :  { %v893_v2 = vsel %vm870_vm10, %v2546_v59, %v847_v58  ;;  %v736_v3 = vsel %vm725_vm9, %v2548_v0, %v2553_v63  ;;  %v1912_v59 = vpop.f32.mrf.mxu0 }
 0x186   :  { %812 = vrot.lane.b32.xlu0 %v1835_v48, %s1410_s7  ;;  %814 = vrot.lane.b32.xlu1 %v1891_v5, %s1410_s7 }
 0x187   :  { %645 = vrot.lane.b32.xlu2 %v1858_v56, %s1409_s6 }
 0x188   :  { %v485_v6 = vpop.permute.xlu1 %484  ;;  %v1902_v15 = vpop.permute.xlu0 %798 }
 0x189   :  { %v555_v18 = vrot.slane %v485_v6, 1  ;;  %v1904_v22 = vpop.permute.xlu2 %510 }
 0x18b   :  { %v602_v23 = vsel %vm580_vm11, %v555_v18, %v556_v8  ;;  %v603_v43 = vsel %vm580_vm11, %v2550_v7, %v555_v18  ;;  %v2554_v18 = vrot.slane %v1807_v40, 1  ;;  %v2555_v7 = vrot.slane %v1904_v22, 1  ;;  %v1961_v13 = vpop.f32.mrf.mxu0 }
 0x18c   :  { %v605_v0 = vadd.f32 %v603_v43, %v1672_v10  ;;  %v606_v43 = vadd.f32 %v602_v23, %v1683_v14  ;;  %v1947_v23 = vpop.f32.mrf.mxu1 }
 0x18e   :  { %v750_v61 = vadd.f32 %v748_v55, %v605_v0  ;;  %790 = vrot.lane.b32.xlu0 %v1858_v56, %s1410_s7  ;;  %792 = vrot.lane.b32.xlu1 %v1912_v59, %s1410_s7 }
 0x18f   :  { %669 = vrot.lane.b32.xlu2 %v1891_v5, %s1409_s6 }
 0x190   :  { %v895_v6 = vadd.f32 %v893_v2, %v750_v61  ;;  %v509_v17 = vpop.permute.xlu1 %508  ;;  %v1925_v19 = vpop.permute.xlu0 %633 }
 0x191   :  { %v567_v28 = vrot.slane %v509_v17, 1  ;;  %v1927_v10 = vpop.permute.xlu2 %802  ;;  %v2556_v0 = vrot.slane %v1925_v19, 2  ;;  %v1940_v61 = vpop.f32.mrf.mxu3 }
 0x192   :  { %v968_v55 = vadd.f32 %v1700_v20, %v895_v6 }
 0x193   :  { %v590_v2 = vsel %vm580_vm11, %v567_v28, %v2555_v7  ;;  %v591_v17 = vsel %vm580_vm11, %v2554_v18, %v567_v28  ;;  %v747_v20 = vsel %vm725_vm9, %v702_v51, %v2556_v0  ;;  %v2559_v51 = vrot.slane %v1927_v10, 3 }
 0x194   :  { %v617_v63 = vadd.f32 %v591_v17, %v1668_v9  ;;  %v751_v14 = vadd.f32 %v747_v20, %v606_v43  ;;  %v2562_v17 = vrot.slane %v1902_v15, 3 }
 0x196   :  { %522 = vrot.lane.b32.xlu0 %v1891_v5, %s1408_s1  ;;  %524 = vrot.lane.b32.xlu1 %v1940_v61, %s1408_s1  ;;  %v762_v6 = vadd.f32 %v736_v3, %v617_v63 }
 0x197   :  { %500 = vrot.lane.b32.xlu2 %v1912_v59, %s1408_s1 }
 0x198   :  { %v801_v28 = vpop.permute.xlu1 %800  ;;  %v779_v20 = vpop.permute.xlu0 %778 }
 0x199   :  { %v859_v43 = vrot.slane %v801_v28, 3  ;;  %v1958_v18 = vpop.permute.xlu2 %488  ;;  %v848_v7 = vrot.slane %v779_v20, 3 }
 0x19a   :  { %v2566_v0 = vrot.slane %v1958_v18, 1 }
 0x19b   :  { %v880_v63 = vsel %vm870_vm10, %v859_v43, %v2559_v51  ;;  %v881_v3 = vsel %vm870_vm10, %v2562_v17, %v859_v43  ;;  %v892_v28 = vsel %vm870_vm10, %v847_v58, %v848_v7  ;;  %v2575_v51 = vrot.slane %v1947_v23, 4  ;;  %v1985_v43 = vpop.f32.mrf.mxu3 }
 0x19c   :  { %v907_v9 = vadd.f32 %v881_v3, %v762_v6  ;;  %v601_v20 = vsel %vm580_vm11, %v556_v8, %v2566_v0  ;;  %v896_v53 = vadd.f32 %v892_v28, %v751_v14  ;;  %v1025_v8 = vsel %vm1024_vm12, %v968_v55, -inf }
 0x19d   :  { %v954_v50 = vsel %vm943_vm0, %v2575_v51, %v2574_v57  ;;  %v618_v28 = vadd.f32 %v590_v2, %v1720_v25 }
 0x19e   :  { %v980_v47 = vadd.f32 %v954_v50, %v907_v9  ;;  %647 = vrot.lane.b32.xlu0 %v1912_v59, %s1409_s6  ;;  %649 = vrot.lane.b32.xlu1 %v1961_v13, %s1409_s6  ;;  %v969_v58 = vadd.f32 %v1718_v24, %v896_v53  ;;  %v2576_v53 = vrot.slane %v1852_v54, 2 }
 0x19f   :  { %526 = vrot.lane.b32.xlu2 %v1985_v43, %s1408_s1 }
 0x1a0   :  { %v781_v12 = vpop.permute.xlu1 %780  ;;  %v1026_v57 = vsel %vm1024_vm12, %v969_v58, -inf  ;;  %v658_v14 = vpop.permute.xlu0 %657 }
 0x1a1   :  { %v849_v6 = vrot.slane %v781_v12, 3  ;;  %v1996_v51 = vpop.permute.xlu2 %782  ;;  %v1027_v50 = vmax.f32 %v1025_v8, %v1026_v57  ;;  %v715_v9 = vrot.slane %v658_v14, 2  ;;  %v2012_v12 = vpop.f32.mrf.mxu0 }
 0x1a2   :  { %v2565_v3 = vrot.slane %v1996_v51, 3 }
 0x1a3   :  { %v891_v24 = vsel %vm870_vm10, %v848_v7, %v849_v6  ;;  %v735_v55 = vsel %vm725_vm9, %v2576_v53, %v715_v9  ;;  %v607_v53 = vadd.f32 %v601_v20, %v1722_v26 }
 0x1a4   :  { %v2010_v58 = vsel %vm870_vm10, %v849_v6, %v2565_v3  ;;  %v763_v8 = vadd.f32 %v735_v55, %v618_v28  ;;  %v2027_v28 = vsel %vm1024_vm12, %v980_v47, -inf }
 0x1a6   :  { %671 = vrot.lane.b32.xlu0 %v1940_v61, %s1409_s6  ;;  %794 = vrot.lane.b32.xlu1 %v1961_v13, %s1410_s7  ;;  %v908_v25 = vadd.f32 %v880_v63, %v763_v8  ;;  %v2577_v8 = vrot.slane %v1925_v19, 2 }
 0x1a7   :  { %651 = vrot.lane.b32.xlu2 %v2012_v12, %s1409_s6 }
 0x1a8   :  { %v2020_v54 = vpop.permute.xlu1 %659  ;;  %v981_v7 = vadd.f32 %v1708_v21, %v908_v25  ;;  %v636_v57 = vpop.permute.xlu0 %635 }
 0x1a9   :  { %v716_v2 = vrot.slane %v2020_v54, 2  ;;  %v2024_v14 = vpop.permute.xlu2 %639  ;;  %v704_v6 = vrot.slane %v636_v57, 2 }
 0x1aa   :  { %v1070_v63 = vsel %vm1024_vm12, %v981_v7, -inf  ;;  %v2563_v20 = vrot.slane %v2024_v14, 2 }
 0x1ab   :  { %v734_v55 = vsel %vm725_vm9, %v715_v9, %v716_v2  ;;  %v1071_v21 = vmax.f32 %v2027_v28, %v1070_v63  ;;  %v746_v25 = vsel %vm725_vm9, %v2577_v8, %v704_v6  ;;  %v1411_v9 = vmov -inf  }
 0x1ac   :  { %v752_v47 = vadd.f32 %v746_v25, %v607_v53  ;;  %v2048_v19 = vsel %vm996_vm13, 0.0, %v1411_v9 }
 0x1ae   :  { %673 = vrot.lane.b32.xlu1 %v1985_v43, %s1409_s6  ;;  %502 = vrot.lane.b32.xlu0 %v1961_v13, %s1408_s1  ;;  %v897_v26 = vadd.f32 %v891_v24, %v752_v47  ;;  %v2578_v47 = vrot.slane %v1904_v22, 1 }
 0x1af   :  { %796 = vrot.lane.b32.xlu2 %v2012_v12, %s1410_s7 }
 0x1b0   :  { %v638_v7 = vpop.permute.xlu1 %637  ;;  %v970_v57 = vadd.f32 %v1737_v29, %v897_v26  ;;  %v513_v4 = vpop.permute.xlu0 %512 }
 0x1b1   :  { %v705_v28 = vrot.slane %v638_v7, 2  ;;  %v2051_v53 = vpop.permute.xlu2 %516  ;;  %v569_v63 = vrot.slane %v513_v4, 1  ;;  %v2064_v26 = vpop.f32.mrf.mxu3 }
 0x1b2   :  { %v1002_v8 = vadd.f32 %v2048_v19, %v970_v57 }
 0x1b3   :  { %v744_v24 = vsel %vm725_vm9, %v705_v28, %v2563_v20  ;;  %v745_v25 = vsel %vm725_vm9, %v704_v6, %v705_v28  ;;  %v589_v29 = vsel %vm580_vm11, %v2578_v47, %v569_v63  ;;  %v2074_v6 = vpop.f32.mrf.mxu2  ;;  %v2564_v28 = vrot.slane %v2051_v53, 1 }
 0x1b4   :  { %v1028_v9 = vsel %vm1024_vm12, %v1002_v8, -inf  ;;  %v619_v7 = vadd.f32 %v589_v29, %v1745_v30 }
 0x1b5   :  { %v2068_v57 = vmax.f32 %v1027_v50, %v1028_v9  ;;  %v934_v50 = vrot.slane %v2074_v6, 4 }
 0x1b6   :  { %528 = vrot.lane.b32.xlu0 %v2064_v26, %s1408_s1  ;;  %504 = vrot.lane.b32.xlu1 %v2012_v12, %s1408_s1  ;;  %v764_v22 = vadd.f32 %v734_v55, %v619_v7  ;;  %v2579_v55 = vrot.slane %v1927_v10, 3 }
 0x1b7   :  { %675 = vrot.lane.b32.xlu2 %v2064_v26, %s1409_s6 }
 0x1b8   :  { %v515_v4 = vpop.permute.xlu1 %514  ;;  %v805_v8 = vpop.permute.xlu0 %804 }
 0x1b9   :  { %v570_v47 = vrot.slane %v515_v4, 1  ;;  %v2079_v30 = vpop.permute.xlu2 %663  ;;  %v861_v29 = vrot.slane %v805_v8, 3  ;;  %v2580_v4 = vrot.slane %v1686_v16, 4 }
 0x1bb   :  { %v587_v9 = vsel %vm580_vm11, %v570_v47, %v2564_v28  ;;  %v588_v17 = vsel %vm580_vm11, %v569_v63, %v570_v47  ;;  %v879_v7 = vsel %vm870_vm10, %v2579_v55, %v861_v29  ;;  %v952_v6 = vsel %vm943_vm0, %v2580_v4, %v934_v50 }
 0x1bc   :  { %v909_v20 = vadd.f32 %v879_v7, %v764_v22  ;;  %v2567_v22 = vrot.slane %v2079_v30, 2  ;;  %v620_v7 = vadd.f32 %v588_v17, %v1755_v32  ;;  %v621_v4 = vadd.f32 %v587_v9, %v1771_v34 }
 0x1bd   :  { %v2581_v32 = vrot.slane %v1958_v18, 1  ;;  %v923_v9 = vrot.slane %v1779_v35, 4  ;;  %v2582_v18 = vrot.slane %v1724_v27, 4 }
 0x1be   :  { %818 = vrot.lane.b32.xlu0 %v1985_v43, %s1410_s7  ;;  %820 = vrot.lane.b32.xlu1 %v2064_v26, %s1410_s7  ;;  %v982_v8 = vadd.f32 %v952_v6, %v909_v20 }
 0x1bf   :  { %816 = vrot.lane.b32.xlu2 %v1940_v61, %s1410_s7 }
 0x1c0   :  { %v662_v10 = vpop.permute.xlu1 %661  ;;  %v1014_v63 = vadd.f32 %v2048_v19, %v982_v8  ;;  %v491_v16 = vpop.permute.xlu0 %490 }
 0x1c1   :  { %v717_v47 = vrot.slane %v662_v10, 2  ;;  %v2104_v55 = vpop.permute.xlu2 %494  ;;  %v558_v28 = vrot.slane %v491_v16, 1  ;;  %v434_v16 = vpop.f32.mrf.mxu2 }
 0x1c2   :  { %v1072_v3 = vsel %vm1024_vm12, %v1014_v63, -inf }
 0x1c3   :  { %v732_v20 = vsel %vm725_vm9, %v717_v47, %v2567_v22  ;;  %v733_v6 = vsel %vm725_vm9, %v716_v2, %v717_v47  ;;  %v2117_v8 = vmax.f32 %v1071_v21, %v1072_v3  ;;  %v600_v34 = vsel %vm580_vm11, %v2581_v32, %v558_v28 }
 0x1c4   :  { %v765_v10 = vadd.f32 %v733_v6, %v620_v7  ;;  %v766_v0 = vadd.f32 %v732_v20, %v621_v4  ;;  %v608_v17 = vadd.f32 %v600_v34, %v1747_v31  ;;  %v560_v2 = vrot.slane %v2104_v55, 1 }
 0x1c5   :  { %v963_v7 = vsel %vm943_vm0, %v2582_v18, %v923_v9  ;;  %v935_v6 = vrot.slane %v434_v16, 4  ;;  %v2583_v16 = vrot.slane %v1996_v51, 3 }
 0x1c6   :  { %v753_v63 = vadd.f32 %v745_v25, %v608_v17 }
 0x1c8   :  { %v493_v22 = vpop.permute.xlu1 %492  ;;  %v898_v54 = vadd.f32 %v2010_v58, %v753_v63  ;;  %v807_v3 = vpop.permute.xlu0 %806 }
 0x1c9   :  { %v559_v21 = vrot.slane %v493_v22, 1  ;;  %v2127_v47 = vpop.permute.xlu2 %810  ;;  %v862_v4 = vrot.slane %v807_v3, 3  ;;  %v2142_v32 = vpop.f32.mrf.mxu2 }
 0x1ca   :  { %v971_v31 = vadd.f32 %v963_v7, %v898_v54  ;;  %v936_v17 = vrot.slane %v2142_v32, 4  ;;  %v864_v63 = vrot.slane %v2127_v47, 3 }
 0x1cb   :  { %v598_v35 = vsel %vm580_vm11, %v559_v21, %v560_v2  ;;  %v599_v58 = vsel %vm580_vm11, %v558_v28, %v559_v21  ;;  %v878_v25 = vsel %vm870_vm10, %v861_v29, %v862_v4  ;;  %v924_v28 = vrot.slane %v1789_v37, 4 }
 0x1cc   :  { %v609_v22 = vadd.f32 %v599_v58, %v1763_v33  ;;  %v910_v20 = vadd.f32 %v878_v25, %v765_v10  ;;  %v951_v33 = vsel %vm943_vm0, %v934_v50, %v935_v6  ;;  %v950_v50 = vsel %vm943_vm0, %v935_v6, %v936_v17 }
 0x1cd   :  { %v962_v25 = vsel %vm943_vm0, %v923_v9, %v924_v28  ;;  %v1036_v51 = vsel %vm1024_vm12, %v971_v31, -inf }
 0x1ce   :  { %v754_v27 = vadd.f32 %v744_v24, %v609_v22  ;;  %v983_v10 = vadd.f32 %v951_v33, %v910_v20 }
 0x1d0   :  { %v809_v34 = vpop.permute.xlu1 %808  ;;  %v785_v54 = vpop.permute.xlu0 %784 }
 0x1d1   :  { %v863_v3 = vrot.slane %v809_v34, 3  ;;  %v2146_v18 = vpop.permute.xlu2 %788  ;;  %v851_v21 = vrot.slane %v785_v54, 3 }
 0x1d3   :  { %v2155_v24 = vsel %vm870_vm10, %v863_v3, %v864_v63  ;;  %v877_v29 = vsel %vm870_vm10, %v862_v4, %v863_v3  ;;  %v889_v7 = vsel %vm870_vm10, %v2583_v16, %v851_v21  ;;  %v2170_v4 = vsel %vm1024_vm12, %v983_v10, -inf }
 0x1d4   :  { %v911_v37 = vadd.f32 %v877_v29, %v766_v0  ;;  %v899_v58 = vadd.f32 %v889_v7, %v754_v27  ;;  %v2568_v27 = vrot.slane %v2146_v18, 3  ;;  %v610_v16 = vadd.f32 %v598_v35, %v1781_v36 }
 0x1d6   :  { %v984_v22 = vadd.f32 %v950_v50, %v911_v37  ;;  %v972_v34 = vadd.f32 %v962_v25, %v899_v58  ;;  %v1136_v37 = vld [vmem:[%s2543_s3 + $0x18] sm:$0xff]  ;;  %v2569_v50 = vrot.slane %v1799_v39, 4  ;;  %v1030_v58 = vrot.slane %v2068_v57, 4 }
 0x1d7   :  { %v2584_v25 = vrot.slane %v2024_v14, 2  ;;  %1184 = vmatpush.msrb.mxu2 %v1136_v37 }
 0x1d8   :  { %v2174_v20 = vsel %vm1024_vm12, %v984_v22, -inf  ;;  %v787_v0 = vpop.permute.xlu1 %786  ;;  %v1037_v54 = vsel %vm1024_vm12, %v972_v34, -inf  ;;  %v642_v9 = vpop.permute.xlu0 %641  ;;  %v1031_v34 = vmax.f32 %v2068_v57, %v1030_v58 }
 0x1d9   :  { %v1082_v6 = vmax.f32 %v2170_v4, %v2174_v20  ;;  %v852_v3 = vrot.slane %v787_v0, 3  ;;  %v2180_v33 = vpop.permute.xlu2 %520  ;;  %v1038_v29 = vmax.f32 %v1036_v51, %v1037_v54  ;;  %v707_v10 = vrot.slane %v642_v9, 2 }
 0x1db   :  { %v2187_v31 = vsel %vm870_vm10, %v852_v3, %v2568_v27  ;;  %v888_v7 = vsel %vm870_vm10, %v851_v21, %v852_v3  ;;  %v743_v36 = vsel %vm725_vm9, %v2584_v25, %v707_v10  ;;  %v961_v21 = vsel %vm943_vm0, %v924_v28, %v2569_v50 }
 0x1dc   :  { %v755_v35 = vadd.f32 %v743_v36, %v610_v16  ;;  %v2585_v28 = vrot.slane %v2051_v53, 1  ;;  %v2570_v36 = vrot.slane %v2180_v33, 1  ;;  %v2586_v50 = vrot.slane %v2079_v30, 2 }
 0x1de   :  { %v900_v22 = vadd.f32 %v888_v7, %v755_v35  ;;  %v1032_v7 = vrot.slane %v1031_v34, 2 }
 0x1e0   :  { %v2205_v51 = vpop.permute.xlu1 %643  ;;  %v973_v0 = vadd.f32 %v961_v21, %v900_v22  ;;  %v519_v54 = vpop.permute.xlu0 %518  ;;  %v1033_v35 = vmax.f32 %v1031_v34, %v1032_v7 }
 0x1e1   :  { %v708_v3 = vrot.slane %v2205_v51, 2  ;;  %v2208_v14 = vpop.permute.xlu2 %645  ;;  %v572_v9 = vrot.slane %v519_v54, 1  ;;  %v2232_v34 = vpop.f32.mrf.mxu2 }
 0x1e2   :  { %v1005_v37 = vadd.f32 %v2048_v19, %v973_v0  ;;  %v1034_v7 = vrot.slane %v1033_v35, 1 }
 0x1e3   :  { %v742_v16 = vsel %vm725_vm9, %v707_v10, %v708_v3  ;;  %v586_v57 = vsel %vm580_vm11, %v2585_v28, %v572_v9  ;;  %v585_v21 = vsel %vm580_vm11, %v572_v9, %v2570_v36 }
 0x1e4   :  { %v1039_v58 = vsel %vm1024_vm12, %v1005_v37, -inf  ;;  %v623_v37 = vadd.f32 %v585_v21, %v1821_v44 }
 0x1e5   :  { %v1040_v25 = vmax.f32 %v1038_v29, %v1039_v58  ;;  %v622_v29 = vadd.f32 %v586_v57, %v1791_v38  ;;  %v937_v38 = vrot.slane %v2232_v34, 4 }
 0x1e7   :  { %v1041_v22 = vrot.slane %v1040_v25, 4  ;;  %v949_v30 = vsel %vm943_vm0, %v936_v17, %v937_v38 }
 0x1e8   :  { %v2225_v0 = vpop.permute.xlu1 %667  ;;  %v666_v10 = vpop.permute.xlu0 %665 }
 0x1e9   :  { %v720_v53 = vrot.slane %v2225_v0, 2  ;;  %v2228_v54 = vpop.permute.xlu2 %669  ;;  %v1042_v28 = vmax.f32 %v1040_v25, %v1041_v22  ;;  %v719_v27 = vrot.slane %v666_v10, 2 }
 0x1eb   :  { %v1043_v58 = vrot.slane %v1042_v28, 2  ;;  %v731_v9 = vsel %vm725_vm9, %v2586_v50, %v719_v27  ;;  %v730_v36 = vsel %vm725_vm9, %v719_v27, %v720_v53  ;;  %v1035_v50 = vmax.f32 %v1033_v35, %v1034_v7  ;;  %v2255_v27 = vld [vmem:[%s2542_s2] ss:$0 sm:$0xff] }
 0x1ec   :  { %v767_v25 = vadd.f32 %v731_v9, %v622_v29  ;;  %v768_v22 = vadd.f32 %v730_v36, %v623_v37 }
 0x1ed   :  { %v1044_v57 = vmax.f32 %v1042_v28, %v1043_v58  ;;  %v1117_v35 = vadd.f32 %v2255_v27, %v1035_v50 }
 0x1ee   :  { %v912_v44 = vadd.f32 %v2155_v24, %v767_v25  ;;  %v1135_v25 = vld [vmem:[%s2543_s3 + $0x10] sm:$0xff] }
 0x1ef   :  { %v1045_v21 = vrot.slane %v1044_v57, 1  ;;  %1185 = vmatpush.msrb.mxu2 %v1135_v25 }
 0x1f0   :  { %v2250_v10 = vpop.permute.xlu1 %498  ;;  %v985_v36 = vadd.f32 %v949_v30, %v912_v44  ;;  %v497_v28 = vpop.permute.xlu0 %496 }
 0x1f1   :  { %v2257_v29 = vpop.permute.xlu2 %500  ;;  %v1046_v24 = vmax.f32 %v1044_v57, %v1045_v21  ;;  %v561_v37 = vrot.slane %v497_v28, 1  ;;  %v2271_v57 = vpop.f32.mrf.mxu2  ;;  %v562_v30 = vrot.slane %v2250_v10, 1 }
 0x1f2   :  { %v1017_v32 = vadd.f32 %v2048_v19, %v985_v36 }
 0x1f3   :  { %v597_v17 = vsel %vm580_vm11, %v560_v2, %v561_v37  ;;  %v1118_v7 = vadd.f32 %v2255_v27, %v1046_v24  ;;  %v596_v4 = vsel %vm580_vm11, %v561_v37, %v562_v30  ;;  %v927_v37 = vrot.slane %v1825_v46, 4 }
 0x1f4   :  { %v1083_v58 = vsel %vm1024_vm12, %v1017_v32, -inf  ;;  %v611_v9 = vadd.f32 %v597_v17, %v1809_v41  ;;  %v1125_v41 = vmax.f32 %v1117_v35, 0.0  ;;  %v612_v10 = vadd.f32 %v596_v4, %v1823_v45 }
 0x1f5   :  { %v2276_v55 = vmax.f32 %v1082_v6, %v1083_v58  ;;  %v1126_v2 = vmax.f32 %v1118_v7, 0.0  ;;  %v926_v35 = vrot.slane %v1811_v42, 4  ;;  %v2587_v45 = vrot.slane %v1799_v39, 4 }
 0x1f6   :  { %v756_v44 = vadd.f32 %v742_v16, %v611_v9  ;;  %v709_v16 = vrot.slane %v2208_v14, 2  ;;  %v2588_v42 = vrot.slane %v2146_v18, 3  ;;  %v721_v18 = vrot.slane %v2228_v54, 2 }
 0x1f7   :  { %v1149_v21 = vrot.slane %v1126_v2, 7  ;;  %v959_v46 = vsel %vm943_vm0, %v926_v35, %v927_v37 }
 0x1f8   :  { %v2279_v50 = vpop.permute.xlu1 %814  ;;  %v901_v36 = vadd.f32 %v2187_v31, %v756_v44  ;;  %v813_v28 = vpop.permute.xlu0 %812  ;;  %v741_v47 = vsel %vm725_vm9, %v708_v3, %v709_v16 }
 0x1f9   :  { %v2282_v24 = vpop.permute.xlu2 %526  ;;  %v865_v32 = vrot.slane %v813_v28, 3  ;;  %v2284_v17 = vsel %vm1150_vm14, %v1149_v21, %v1125_v41  ;;  %v2294_v31 = vpop.f32.mrf.mxu2  ;;  %v757_v14 = vadd.f32 %v741_v47, %v612_v10  ;;  %v938_v10 = vrot.slane %v2271_v57, 4 }
 0x1fa   :  { %v2589_v47 = vrot.slane %v2180_v33, 1  ;;  %v939_v54 = vrot.slane %v2294_v31, 4  ;;  %v729_v57 = vsel %vm725_vm9, %v720_v53, %v721_v18 }
 0x1fb   :  { %v875_v20 = vsel %vm870_vm10, %v864_v63, %v865_v32  ;;  %v948_v33 = vsel %vm943_vm0, %v937_v38, %v938_v10 }
 0x1fc   :  { %v913_v6 = vadd.f32 %v875_v20, %v768_v22  ;;  %v960_v22 = vsel %vm943_vm0, %v2587_v45, %v926_v35  ;;  %v563_v35 = vrot.slane %v2257_v29, 1  ;;  %v947_v34 = vsel %vm943_vm0, %v938_v10, %v939_v54 }
 0x1fd   :  { %v974_v2 = vadd.f32 %v960_v22, %v901_v36  ;;  %v1134_v22 = vld [vmem:[%s2543_s3 + $0x8] sm:$0xff] }
 0x1fe   :  { %1186 = vmatpush.msrb.mxu2 %v1134_v22  ;;  %v986_v0 = vadd.f32 %v948_v33, %v913_v6 }
 0x1ff   :  { %v1047_v39 = vsel %vm1024_vm12, %v974_v2, -inf }
 0x200   :  { %v2297_v7 = vpop.permute.xlu1 %792  ;;  %v791_v58 = vpop.permute.xlu0 %790 }
 0x201   :  { %v2299_v9 = vpop.permute.xlu2 %651  ;;  %v854_v63 = vrot.slane %v791_v58, 3  ;;  %v2316_v41 = vpop.f32.mrf.mxu2  ;;  %v866_v58 = vrot.slane %v2279_v50, 3  ;;  %v855_v38 = vrot.slane %v2297_v7, 3 }
 0x203   :  { %v886_v25 = vsel %vm870_vm10, %v2588_v42, %v854_v63  ;;  %v874_v31 = vsel %vm870_vm10, %v865_v32, %v866_v58  ;;  %v928_v32 = vrot.slane %v1844_v49, 4 }
 0x204   :  { %v902_v44 = vadd.f32 %v886_v25, %v757_v14 }
 0x205   :  { %v958_v49 = vsel %vm943_vm0, %v927_v37, %v928_v32  ;;  %v940_v37 = vrot.slane %v2316_v41, 4  ;;  %v1133_v41 = vld [vmem:[%s2543_s3] sm:$0xff] }
 0x206   :  { %v975_v51 = vadd.f32 %v959_v46, %v902_v44  ;;  %1187 = vmatpush.msrb.mxu2 %v1133_v41 }
 0x208   :  { %v2318_v3 = vpop.permute.xlu1 %524  ;;  %v1048_v21 = vsel %vm1024_vm12, %v975_v51, -inf  ;;  %v523_v28 = vpop.permute.xlu0 %522 }
 0x209   :  { %v2322_v4 = vpop.permute.xlu2 %796  ;;  %v1049_v20 = vmax.f32 %v1047_v39, %v1048_v21  ;;  %v574_v36 = vrot.slane %v523_v28, 1  ;;  %v452_v46 = vpop.f32.mrf.mxu2  ;;  %v575_v6 = vrot.slane %v2318_v3, 1  ;;  %v1091_v21 = vsel %vm1024_vm12, %v986_v0, -inf }
 0x20b   :  { %v584_v14 = vsel %vm580_vm11, %v2589_v47, %v574_v36  ;;  %v583_v3 = vsel %vm580_vm11, %v574_v36, %v575_v6 }
 0x20c   :  { %v624_v45 = vadd.f32 %v584_v14, %v1835_v48  ;;  %v595_v48 = vsel %vm580_vm11, %v562_v30, %v563_v35 }
 0x20d   :  { %v613_v30 = vadd.f32 %v595_v48, %v1858_v56  ;;  %v885_v56 = vsel %vm870_vm10, %v854_v63, %v855_v38  ;;  %v625_v63 = vadd.f32 %v583_v3, %v1891_v5 }
 0x20e   :  { %v769_v50 = vadd.f32 %v729_v57, %v624_v45 }
 0x210   :  { %v2351_v42 = vpop.permute.xlu1 %649  ;;  %v914_v25 = vadd.f32 %v874_v31, %v769_v50  ;;  %v2353_v53 = vpop.permute.xlu0 %647  ;;  %v929_v31 = vrot.slane %v1875_v62, 4  ;;  %v946_v62 = vsel %vm943_vm0, %v939_v54, %v940_v37 }
 0x211   :  { %v2355_v2 = vpop.permute.xlu2 %675  ;;  %v710_v44 = vrot.slane %v2353_v53, 2  ;;  %v455_v0 = vpop.f32.mrf.mxu2  ;;  %v711_v54 = vrot.slane %v2351_v42, 2  ;;  %v2592_v53 = vrot.slane %v1871_v60, 2 }
 0x212   :  { %v987_v51 = vadd.f32 %v947_v34, %v914_v25 }
 0x213   :  { %v740_v39 = vsel %vm725_vm9, %v709_v16, %v710_v44  ;;  %v739_v29 = vsel %vm725_vm9, %v710_v44, %v711_v54 }
 0x214   :  { %v1092_v28 = vsel %vm1024_vm12, %v987_v51, -inf  ;;  %v758_v10 = vadd.f32 %v740_v39, %v613_v30  ;;  %v941_v30 = vrot.slane %v452_v46, 4  ;;  %v1074_v39 = vrot.slane %v2117_v8, 4 }
 0x215   :  { %v1093_v47 = vmax.f32 %v1091_v21, %v1092_v28  ;;  %v942_v21 = vrot.slane %v455_v0, 4 }
 0x216   :  { %v903_v14 = vadd.f32 %v885_v56, %v758_v10 }
 0x218   :  { %v2378_v45 = vpop.permute.xlu1 %794  ;;  %v976_v16 = vadd.f32 %v958_v49, %v903_v14  ;;  %v2380_v22 = vpop.permute.xlu0 %671  ;;  %v2415_v14 = vsel %vm943_vm0, %v941_v30, %v942_v21 }
 0x219   :  { %v2382_v57 = vpop.permute.xlu2 %816  ;;  %v722_v50 = vrot.slane %v2380_v22, 2 }
 0x21a   :  { %v867_v33 = vrot.slane %v2382_v57, 3  ;;  %v1008_v48 = vadd.f32 %v2048_v19, %v976_v16  ;;  %v930_v16 = vrot.slane %v1914_v52, 4 }
 0x21b   :  { %v728_v36 = vsel %vm725_vm9, %v721_v18, %v722_v50 }
 0x21c   :  { %v1050_v25 = vsel %vm1024_vm12, %v1008_v48, -inf  ;;  %v770_v34 = vadd.f32 %v728_v36, %v625_v63  ;;  %v873_v5 = vsel %vm870_vm10, %v866_v58, %v867_v33  ;;  %v957_v58 = vsel %vm943_vm0, %v928_v32, %v929_v31 }
 0x21d   :  { %v1051_v51 = vmax.f32 %v1049_v20, %v1050_v25  ;;  %v2409_v20 = vsel %vm943_vm0, %v940_v37, %v941_v30  ;;  %v2420_v63 = vmax.f32 %v2117_v8, %v1074_v39  ;;  %v1085_v48 = vrot.slane %v2276_v55, 4 }
 0x21e   :  { %v915_v18 = vadd.f32 %v873_v5, %v770_v34  ;;  %v576_v32 = vrot.slane %v2282_v24, 1  ;;  %v712_v36 = vrot.slane %v2299_v9, 2  ;;  %v2590_v25 = vrot.slane %v1674_v11, 4 }
 0x21f   :  { %v1052_v28 = vrot.slane %v1051_v51, 4  ;;  %v857_v8 = vrot.slane %v2322_v4, 3  ;;  %v856_v11 = vrot.slane %v2378_v45, 3  ;;  %v2591_v4 = vrot.slane %v1947_v23, 4 }
 0x220   :  { %v2405_v46 = vpop.permute.xlu1 %673  ;;  %v988_v10 = vadd.f32 %v946_v62, %v915_v18  ;;  %v503_v56 = vpop.permute.xlu0 %502  ;;  %v2434_v52 = vsel %vm943_vm0, %v942_v21, %v2590_v25  ;;  %v582_v9 = vsel %vm580_vm11, %v575_v6, %v576_v32  ;;  %v1076_v6 = vrot.slane %v2420_v63, 2 }
 0x221   :  { %v1053_v49 = vmax.f32 %v1051_v51, %v1052_v28  ;;  %v564_v3 = vrot.slane %v503_v56, 1  ;;  %v955_v51 = vsel %vm943_vm0, %v930_v16, %v2591_v4  ;;  %v1086_v41 = vmax.f32 %v2276_v55, %v1085_v48 }
 0x222   :  { %v1020_v37 = vadd.f32 %v2048_v19, %v988_v10  ;;  %v737_v44 = vsel %vm725_vm9, %v712_v36, %v2592_v53  ;;  %v2593_v23 = vrot.slane %v1902_v15, 3  ;;  %v884_v60 = vsel %vm870_vm10, %v855_v38, %v856_v11 }
 0x223   :  { %v1054_v0 = vrot.slane %v1053_v49, 2  ;;  %v594_v42 = vsel %vm580_vm11, %v563_v35, %v564_v3  ;;  %v956_v35 = vsel %vm943_vm0, %v929_v31, %v930_v16  ;;  %v626_v31 = vadd.f32 %v582_v9, %v1940_v61  ;;  %v2595_v16 = vld [vmem:[#allocation6_spill] sm:$0xff] }
 0x224   :  { %v1094_v34 = vsel %vm1024_vm12, %v1020_v37, -inf  ;;  %v614_v24 = vadd.f32 %v594_v42, %v1912_v59  ;;  %v882_v18 = vsel %vm870_vm10, %v857_v8, %v2593_v23  ;;  %v723_v55 = vrot.slane %v2405_v46, 2  ;;  %v2599_v23 = vld [vmem:[#allocation7_spill] sm:$0xff] }
 0x225   :  { %v1055_v30 = vmax.f32 %v1053_v49, %v1054_v0  ;;  %v1095_v59 = vmax.f32 %v1093_v47, %v1094_v34  ;;  %v724_v47 = vrot.slane %v2355_v2, 2  ;;  %v2594_v15 = vrot.slane %v1807_v40, 1  ;;  %v2597_v0 = vld [vmem:[#allocation5_spill] sm:$0xff] }
 0x226   :  { %v759_v5 = vadd.f32 %v739_v29, %v614_v24  ;;  %v2596_v48 = vrot.slane %v2595_v16, 1  ;;  %v738_v40 = vsel %vm725_vm9, %v711_v54, %v712_v36  ;;  %v2598_v42 = vrot.slane %v2597_v0, 2 }
 0x227   :  { %v1056_v45 = vrot.slane %v1055_v30, 1  ;;  %v1096_v56 = vrot.slane %v1095_v59, 4 }
 0x228   :  { %v505_v39 = vpop.permute.xlu1 %504  ;;  %v529_v62 = vpop.permute.xlu0 %528  ;;  %v904_v61 = vadd.f32 %v884_v60, %v759_v5 }
 0x229   :  { %v565_v21 = vrot.slane %v505_v39, 1  ;;  %v577_v28 = vrot.slane %v529_v62, 1  ;;  %v1057_v10 = vmax.f32 %v1055_v30, %v1056_v45  ;;  %v1097_v54 = vmax.f32 %v1095_v59, %v1096_v56 }
 0x22a   :  { %v977_v36 = vadd.f32 %v957_v58, %v904_v61  ;;  %v2600_v62 = vrot.slane %v2599_v23, 3  ;;  %v1077_v56 = vmax.f32 %v2420_v63, %v1076_v6 }
 0x22b   :  { %v592_v49 = vsel %vm580_vm11, %v565_v21, %v2594_v15  ;;  %v593_v2 = vsel %vm580_vm11, %v564_v3, %v565_v21  ;;  %v581_v7 = vsel %vm580_vm11, %v576_v32, %v577_v28  ;;  %v604_v38 = vsel %vm580_vm11, %v577_v28, %v2596_v48 }
 0x22c   :  { %v615_v46 = vadd.f32 %v593_v2, %v1961_v13  ;;  %v616_v37 = vadd.f32 %v592_v49, %v2012_v12  ;;  %v749_v3 = vsel %vm725_vm9, %v724_v47, %v2598_v42  ;;  %v883_v32 = vsel %vm870_vm10, %v856_v11, %v857_v8 }
 0x22d   :  { %v628_v25 = vadd.f32 %v604_v38, %v2064_v26  ;;  %v727_v13 = vsel %vm725_vm9, %v722_v50, %v723_v55  ;;  %v1119_v24 = vadd.f32 %v2255_v27, %v1057_v10  ;;  %v627_v9 = vadd.f32 %v581_v7, %v1985_v43 }
 0x22e   :  { %v760_v34 = vadd.f32 %v738_v40, %v615_v46  ;;  %v761_v12 = vadd.f32 %v737_v44, %v616_v37  ;;  %v1087_v8 = vrot.slane %v1086_v41, 2  ;;  %v726_v26 = vsel %vm725_vm9, %v723_v55, %v724_v47 }
 0x22f   :  { %v773_v30 = vadd.f32 %v749_v3, %v628_v25  ;;  %v1127_v11 = vmax.f32 %v1119_v24, 0.0  ;;  %v771_v22 = vadd.f32 %v727_v13, %v626_v31  ;;  %v1058_v58 = vsel %vm1024_vm12, %v977_v36, -inf }
 0x230   :  { %v905_v29 = vadd.f32 %v883_v32, %v760_v34  ;;  %v906_v4 = vadd.f32 %v882_v18, %v761_v12  ;;  %v821_v5 = vpop.permute.xlu1 %820  ;;  %v819_v53 = vpop.permute.xlu0 %818  ;;  %v772_v43 = vadd.f32 %v726_v26, %v627_v9  ;;  %v1098_v21 = vrot.slane %v1097_v54, 2 }
 0x231   :  { %v869_v50 = vrot.slane %v821_v5, 3  ;;  %v868_v39 = vrot.slane %v819_v53, 3  ;;  %v1152_v59 = vrot.slane %v1127_v11, 6  ;;  %v1088_v15 = vmax.f32 %v1086_v41, %v1087_v8 }
 0x232   :  { %v978_v44 = vadd.f32 %v956_v35, %v905_v29  ;;  %v979_v45 = vadd.f32 %v955_v51, %v906_v4  ;;  %v1099_v7 = vmax.f32 %v1097_v54, %v1098_v21  ;;  %v1078_v41 = vrot.slane %v1077_v56, 1 }
 0x233   :  { %v894_v18 = vsel %vm870_vm10, %v869_v50, %v2600_v62  ;;  %v872_v35 = vsel %vm870_vm10, %v867_v33, %v868_v39  ;;  %v871_v51 = vsel %vm870_vm10, %v868_v39, %v869_v50  ;;  %v1154_v49 = vsel %vm1153_vm15, %v1152_v59, %v2284_v17 }
 0x234   :  { %v1011_v60 = vadd.f32 %v2048_v19, %v979_v45  ;;  %v1059_v31 = vsel %vm1024_vm12, %v978_v44, -inf  ;;  %v916_v55 = vadd.f32 %v872_v35, %v771_v22  ;;  %v917_v28 = vadd.f32 %v871_v51, %v772_v43 }
 0x235   :  { %v1060_v47 = vmax.f32 %v1058_v58, %v1059_v31  ;;  %v918_v10 = vadd.f32 %v894_v18, %v773_v30  ;;  %v1089_v37 = vrot.slane %v1088_v15, 1  ;;  %v1079_v42 = vmax.f32 %v1077_v56, %v1078_v41 }
 0x236   :  { %v1061_v61 = vsel %vm1024_vm12, %v1011_v60, -inf  ;;  %v989_v57 = vadd.f32 %v2409_v20, %v916_v55  ;;  %v990_v33 = vadd.f32 %v2415_v14, %v917_v28  ;;  %v1100_v20 = vrot.slane %v1099_v7, 1 }
 0x237   :  { %v1062_v2 = vmax.f32 %v1060_v47, %v1061_v61  ;;  %v991_v1 = vadd.f32 %v2434_v52, %v918_v10  ;;  %v1090_v3 = vmax.f32 %v1088_v15, %v1089_v37 }
 0x238   :  { %v1102_v48 = vsel %vm1024_vm12, %v989_v57, -inf  ;;  %v1103_v63 = vsel %vm1024_vm12, %v990_v33, -inf  ;;  %v1101_v32 = vmax.f32 %v1099_v7, %v1100_v20 }
 0x239   :  { %v1063_v16 = vrot.slane %v1062_v2, 4  ;;  %v1023_v38 = vadd.f32 %v2048_v19, %v991_v1  ;;  %v1104_v6 = vmax.f32 %v1102_v48, %v1103_v63  ;;  %v1121_v19 = vadd.f32 %v2255_v27, %v1079_v42 }
 0x23a   :  { %v1122_v24 = vadd.f32 %v2255_v27, %v1090_v3  ;;  %v1123_v36 = vadd.f32 %v2255_v27, %v1101_v32 }
 0x23b   :  { %v1064_v46 = vmax.f32 %v1062_v2, %v1063_v16  ;;  %v1105_v17 = vsel %vm1024_vm12, %v1023_v38, -inf  ;;  %v1129_v29 = vmax.f32 %v1121_v19, 0.0 }
 0x23c   :  { %v1106_v40 = vmax.f32 %v1104_v6, %v1105_v17  ;;  %v1130_v5 = vmax.f32 %v1122_v24, 0.0  ;;  %v1131_v11 = vmax.f32 %v1123_v36, 0.0 }
 0x23d   :  { %v1065_v0 = vrot.slane %v1064_v46, 2  ;;  %v1158_v53 = vrot.slane %v1129_v29, 4 }
 0x23e   :  { %v1107_v14 = vrot.slane %v1106_v40, 4  ;;  %v1161_v44 = vrot.slane %v1130_v5, 3  ;;  %v1164_v59 = vrot.slane %v1131_v11, 2 }
 0x23f   :  { %v1066_v52 = vmax.f32 %v1064_v46, %v1065_v0 }
 0x240   :  { %v1108_v25 = vmax.f32 %v1106_v40, %v1107_v14 }
 0x241   :  { %v1067_v13 = vrot.slane %v1066_v52, 1 }
 0x242   :  { %v1109_v34 = vrot.slane %v1108_v25, 2 }
 0x243   :  { %v1068_v12 = vmax.f32 %v1066_v52, %v1067_v13 }
 0x244   :  { %v1110_v54 = vmax.f32 %v1108_v25, %v1109_v34 }
 0x245   :  { %v1120_v9 = vadd.f32 %v2255_v27, %v1068_v12 }
 0x246   :  { %v1111_v30 = vrot.slane %v1110_v54, 1 }
 0x247   :  { %v1128_v4 = vmax.f32 %v1120_v9, 0.0 }
 0x248   :  { %v1112_v8 = vmax.f32 %v1110_v54, %v1111_v30 }
 0x249   :  { %v1155_v26 = vrot.slane %v1128_v4, 5 }
 0x24a   :  { %v1124_v22 = vadd.f32 %v2255_v27, %v1112_v8  ;;  %v1376_v27 = vld [vmem:[%s2544_s4] ss:$0 sm:$0xff]  ;;  %s1412_s4 = smov [#allocation2]  }
 0x24b   :  { %v1157_v50 = vsel %vm1156_vm1, %v1155_v26, %v1154_v49  ;;  %s1234_s18 = sshll.u32 %s1412_s4, 4  ;;  %s1235_s18 = int_to_ptr.vmem [resolvable:$true] %s1234_s18 }
 0x24c   :  { %v1132_v45 = vmax.f32 %v1124_v22, 0.0  ;;  %v1160_v39 = vsel %vm1159_vm2, %v1158_v53, %v1157_v50 }
 0x24d   :  { %v1163_v58 = vsel %vm1162_vm3, %v1161_v44, %v1160_v39 }
 0x24e   :  { %v1166_v43 = vsel %vm1165_vm4, %v1164_v59, %v1163_v58  ;;  %v1167_v23 = vrot.slane %v1132_v45, 1 }
 0x250   :  { %v1169_v62 = vsel %vm1168_vm5, %v1167_v23, %v1166_v43 }
 0x251   :  { %1218 = vrot.lane.b32.xlu0 %v1169_v62, %s1410_s7  ;;  %1317 = vmatmul.msk.f32.vlgmr.msrb.gmra.mxu2 %vm1024_vm12, %v1169_v62 }
 0x2c3   :  { %v1219_v1 = vpop.permute.xlu0 %1218 }
 0x2d4   :  { %v1189_v18 = vpop.f32.mrf.mxu2 }
 0x2d5   :  { %v1190_v21 = vadd.f32 %v1376_v27, %v1189_v18 }
 0x2d7   :  { %v1192_v60 = vmax.f32 %v1190_v21, 0.0  ;;  %v1318_v31 = vmul.f32 -1.442695, %v1190_v21 }
 0x2d9   :  { %1213 = vrot.lane.b32.xlu2 %v1192_v60, %s1410_s7  ;;  %1377 = vpow2.f32 %v1318_v31 }
 0x2df   :  { %v1378_v35 = vpop.eup %1377 }
 0x2e0   :  { %v1196_v51 = vadd.f32 1.0, %v1378_v35 }
 0x2e2   :  { %1379 = vrcp.f32 %v1196_v51  ;;  %v1208_v61 = vand.u32 2147483648, %v1196_v51  ;;  %vm1202_vm7 = vweird.f32 %v1196_v51  ;;  %v1206_v15 = vand.u32 2147483647, %v1196_v51 }
 0x2e4   :  { %v1209_v2 = vor.u32 1.1754944e-38, %v1208_v61  ;;  %vm1207_vm0 = vcmp.eq.f32.partialorder %v1206_v15, 8.507059e+37 }
 0x2e8   :  { %v1380_v47 = vpop.eup %1379 }
 0x2e9   :  { %v1198_v55 = vmul.f32 %v1380_v47, %v1196_v51  ;;  %vm1203_vm6 = vweird.f32 %v1380_v47 }
 0x2ea   :  { %vm1204_vm8 = vmor %vm1202_vm7, %vm1203_vm6 }
 0x2eb   :  { %v1199_v28 = vsub.f32 1.0, %v1198_v55 }
 0x2ed   :  { %v1200_v10 = vmul.f32 %v1380_v47, %v1199_v28 }
 0x2ef   :  { %v1201_v56 = vadd.f32 %v1380_v47, %v1200_v10 }
 0x2f1   :  { %v1205_v49 = vsel %vm1204_vm8, %v1380_v47, %v1201_v56 }
 0x2f2   :  { %v1210_v57 = vsel %vm1207_vm0, %v1209_v2, %v1205_v49 }
 0x2f3   :  { %v1217_v33 = vsub.f32 1.0, %v1210_v57 }
 0x2f5   :  { %v1221_v16 = vmul.f32 %v1219_v1, %v1217_v33 }
 0x333   :  { %v1214_v7 = vpop.permute.xlu2 %1213 }
 0x334   :  { %v1216_v48 = vmul.f32 %v1214_v7, %v1210_v57 }
 0x336   :  { %v1222_v38 = vadd.f32 %v1221_v16, %v1216_v48 }
 0x338   :  { %1224 = vrot.lane.b32.xlu1 %v1222_v38, %s1408_s1 }
 0x3aa   :  { %v1225_v63 = vpop.permute.xlu1 %1224 }
 0x3ab   :  { %v1227_v6 = vsel %vm1024_vm12, %v1225_v63, 0.0 }
 0x3ac   :  { %1228 = vst [vmem:[#allocation2] sm:$0xff] %v1227_v6 }
 0x3ad   :  { %1239 = dma.vmem_to_hbm [thread:$0]  %s1235_s18, 128, %s1237_s20, [#allocation3]  }
 0x3ae   :  { %1405 = dma.done.wait [#allocation3], 128  }
 0x3af   :  { %1406 = vsyncadd [#allocation3], 4294967168 }
 0x3b0   :  { %1244 = vsyncpa [#allocation3], 1 }

</bundles_post_ra>
